<compile_context>
chip_gen: v6e
topology: v6e:2x2x1
jax: 0.10.0
libtpu: 0.0.40
codegen_flags: <defaults>
</compile_context>

<pallas_src>
import functools

import jax
import jax.numpy as jnp
from jax import lax
from jax.experimental import pallas as pl
from jax.experimental.pallas import tpu as pltpu


def scale_atten_kernel(Bt, H, W, C, CMID,
                       x_ref, w1b1_ref, w2b2_ref, wb1_ref, bn_ref, wb2_ref, shift_ref,
                       out_ref, ca_ref, sa_ref):
    WC = W * C
    xf = x_ref[...]                                    # (Bt*H, W*C) f32, lane-dense

    # ---- ChannelGate: global avg & max pooling over HxW, per image ----
    # Per-image reduce over the H rows (2-D sublane reduces on aligned row blocks), then a
    # log2(W) circular roll-and-reduce over the W lane blocks (direction-agnostic, exact).
    sums, maxs = [], []
    for b in range(Bt):
        xi = xf[b * H:(b + 1) * H, :]
        sums.append(jnp.sum(xi, axis=0, keepdims=True))
        maxs.append(jnp.max(xi, axis=0, keepdims=True))
    colsum = jnp.concatenate(sums, axis=0) if Bt > 1 else sums[0]      # (Bt, W*C)
    colmax = jnp.concatenate(maxs, axis=0) if Bt > 1 else maxs[0]

    if W & (W - 1) == 0:
        shift = C
        while shift < WC:                              # 4 lane rolls + 4 VPU ops for W=16
            colsum = colsum + pltpu.roll(colsum, shift=shift, axis=1)
            colmax = jnp.maximum(colmax, pltpu.roll(colmax, shift=shift, axis=1))
            shift *= 2
        tot_sum = colsum[:, 0:C]
        tot_max = colmax[:, 0:C]
    else:
        # TODO(synk): non-power-of-two W falls back to the masked lane-slice reduction.
        tot_sum = colsum[:, 0:C]
        tot_max = colmax[:, 0:C]
        for w in range(1, W):
            tot_sum = tot_sum + colsum[:, w * C:(w + 1) * C]
            tot_max = jnp.maximum(tot_max, colmax[:, w * C:(w + 1) * C])
    avg = tot_sum * (1.0 / (H * W))                    # (Bt, C)
    mx = tot_max                                       # (Bt, C)

    # ---- ChannelGate MLP: avg & max fused along M; layer 2 pre-widened to W*C lanes ----
    w1 = w1b1_ref[0:C, :]                              # (C, CMID)
    b1 = w1b1_ref[C:C + 1, :]                          # (1, CMID)
    w2w = w2b2_ref[0:CMID, :]                          # (CMID, W*C)
    b2w = w2b2_ref[CMID:CMID + 1, :]                   # (1, W*C)
    v = jnp.concatenate([avg, mx], axis=0)             # (2*Bt, C)
    hmid = jnp.maximum(jnp.dot(v, w1, preferred_element_type=jnp.float32) + b1, 0.0)
    o = jnp.dot(hmid, w2w, preferred_element_type=jnp.float32) + b2w    # (2*Bt, W*C)
    ca_wide = jax.nn.sigmoid(o[0:Bt, :] + o[Bt:2 * Bt, :])              # (Bt, W*C)
    ca_ref[0] = ca_wide[:, 0:C]

    # Channel-scaled input x1, kept flattened over Bt*H rows (the MXU M dimension).
    x1_blocks = [xf[b * H:(b + 1) * H, :] * ca_wide[b:b + 1, :] for b in range(Bt)]
    x1 = jnp.concatenate(x1_blocks, axis=0) if Bt > 1 else x1_blocks[0]  # (Bt*H, W*C)

    # ---- SpatialAtten conv1: 3x3 conv (C -> CMID) as block-banded matmuls (kx folded);
    #      the ky row shifts (with per-image edge zeroing) are exact 0/1 matrices on the MXU.
    mm_dtype = wb1_ref.dtype                           # bf16 operands, f32 accumulation
    x1m = x1.astype(mm_dtype)
    p0 = jnp.dot(x1m, wb1_ref[0], preferred_element_type=jnp.float32)   # (Bt*H, W*CMID)
    p1 = jnp.dot(x1m, wb1_ref[1], preferred_element_type=jnp.float32)
    p2 = jnp.dot(x1m, wb1_ref[2], preferred_element_type=jnp.float32)
    y = (jnp.dot(shift_ref[0], p0, preferred_element_type=jnp.float32)  # out[r] <- p0[r-1]
         + p1
         + jnp.dot(shift_ref[1], p2, preferred_element_type=jnp.float32))  # out[r] <- p2[r+1]

    # Folded inference BatchNorm + ReLU (kept in f32 on the VPU).
    y = jnp.maximum(y * bn_ref[0:1, :] + bn_ref[1:2, :], 0.0)

    # conv2: 1x1 conv (CMID -> C) as block-diagonal matmul, ReLU, sigmoid.
    z = jnp.dot(y.astype(mm_dtype), wb2_ref[...], preferred_element_type=jnp.float32)
    sa = jax.nn.sigmoid(jnp.maximum(z, 0.0))           # (Bt*H, W*C)

    out_ref[...] = x1 * sa + x1
    sa_ref[...] = sa


def prepare_wide_params(p, B, H, W, *, matmul_dtype=jnp.bfloat16, target_rows=128):
    """Host-side prep: pick the batch tile Bt (Bt*H rows ~ target_rows for MXU M fill),
    build block-banded conv1 / block-diagonal conv2 weights in the wide lane layout (cast to
    the MXU operand dtype), widen the MLP layer-2 weights (kills the in-kernel ca broadcast),
    pack the small params, and build the 0/1 row-shift matrices for the 3x3 conv's ky taps."""
    conv1 = p["conv1_hwio"]                            # (3, 3, C, CMID)
    _, _, C, CMID = conv1.shape

    Bt = max(1, min(B, target_rows // H))
    while B % Bt:
        Bt -= 1
    BtH = Bt * H

    # conv1: fold kx into the block-band structure; one (W*C, W*CMID) weight per ky.
    wb1 = jnp.zeros((3, W * C, W * CMID), jnp.float32)
    for w in range(W):
        for kx in range(3):
            wsrc = w + kx - 1
            if 0 <= wsrc < W:
                wb1 = wb1.at[:, wsrc * C:(wsrc + 1) * C,
                             w * CMID:(w + 1) * CMID].set(conv1[:, kx])
    # conv2: 1x1 conv (CMID -> C) as a block-diagonal (W*CMID, W*C) weight.
    wb2 = jnp.kron(jnp.eye(W, dtype=jnp.float32), p["wc2"])

    # ky row shifts over the flattened Bt*H rows as exact 0/1 matrices; rows at image
    # boundaries are zeroed, reproducing the 'SAME' zero padding in H.
    rows = jnp.arange(BtH)
    eye = jnp.eye(BtH, dtype=jnp.float32)
    s_up = jnp.where(((rows % H) > 0)[:, None], jnp.roll(eye, -1, axis=1), 0.0)
    s_dn = jnp.where(((rows % H) < H - 1)[:, None], jnp.roll(eye, 1, axis=1), 0.0)
    shifts = jnp.stack([s_up, s_dn], axis=0)           # (2, Bt*H, Bt*H)

    # Packed small params: MLP layer 1 (w1 stacked on b1), widened layer 2 (w2|b2 tiled over
    # the W lane blocks), folded BN scale/bias tiled over the W lane blocks.
    w1b1 = jnp.concatenate([p["w1"], p["b1"]], axis=0)                    # (C+1, CMID)
    w2b2 = jnp.concatenate([jnp.tile(p["w2"], (1, W)),
                            jnp.tile(p["b2"], (1, W))], axis=0)           # (CMID+1, W*C)
    bn = jnp.concatenate([jnp.tile(p["bn_s"], (1, W)),
                          jnp.tile(p["bn_t"], (1, W))], axis=0)           # (2, W*CMID)

    return {
        "Bt": Bt,
        "w1b1": w1b1, "w2b2": w2b2, "bn": bn,
        "wb1": wb1.astype(matmul_dtype), "wb2": wb2.astype(matmul_dtype),
        "shifts": shifts,
    }


def scale_atten_block(x, wp):
    """x: (B, H, W, C) float32, NHWC. Returns (x_out, ca_atten, sa_atten), all NHWC."""
    B, H, W, C = x.shape
    CMID = wp["w1b1"].shape[1]
    WC = W * C
    Bt = int(wp["Bt"])
    assert B % Bt == 0
    assert WC % 128 == 0, "lane-dense layout assumes W*C is a multiple of 128"

    xw = x.reshape(B * H, WC)                          # free reshape -> lane-dense row slab
    BtH = Bt * H

    def const_spec(a):
        nd = a.ndim
        return pl.BlockSpec(a.shape, lambda b: (0,) * nd)

    row_spec = pl.BlockSpec((BtH, WC), lambda b: (b, 0))
    ca_spec = pl.BlockSpec((1, Bt, C), lambda b: (b, 0, 0))

    kernel = functools.partial(scale_atten_kernel, Bt, H, W, C, CMID)
    grid_spec = pltpu.PrefetchScalarGridSpec(
        num_scalar_prefetch=0,
        grid=(B // Bt,),
        in_specs=[
            row_spec,
            const_spec(wp["w1b1"]), const_spec(wp["w2b2"]),
            const_spec(wp["wb1"]), const_spec(wp["bn"]), const_spec(wp["wb2"]),
            const_spec(wp["shifts"]),
        ],
        out_specs=[row_spec, ca_spec, row_spec],
    )
    fn = pl.pallas_call(
        kernel,
        out_shape=(jax.ShapeDtypeStruct((B * H, WC), jnp.float32),
                   jax.ShapeDtypeStruct((B // Bt, Bt, C), jnp.float32),
                   jax.ShapeDtypeStruct((B * H, WC), jnp.float32)),
        grid_spec=grid_spec,
        compiler_params=pltpu.CompilerParams(
            dimension_semantics=("parallel",),
            vmem_limit_bytes=32 * 1024 * 1024),
    )
    out_w, ca3, sa_w = fn(xw, wp["w1b1"], wp["w2b2"], wp["wb1"], wp["bn"],
                          wp["wb2"], wp["shifts"])
    out = out_w.reshape(B, H, W, C)
    sa = sa_w.reshape(B, H, W, C)
    ca = ca3.reshape(B, C)
    ca_full = jnp.broadcast_to(ca[:, None, None, :], (B, H, W, C))
    return out, ca_full, sa


def make_params(key, C, CMID):
    ks = jax.random.split(key, 10)
    p = {}
    # ChannelGate MLP (Linear weights stored pre-transposed: (in, out)), biases kept.
    p["w1"] = 0.1 * jax.random.normal(ks[0], (C, CMID), jnp.float32)
    p["b1"] = 0.1 * jax.random.normal(ks[1], (1, CMID), jnp.float32)
    p["w2"] = 0.1 * jax.random.normal(ks[2], (CMID, C), jnp.float32)
    p["b2"] = 0.1 * jax.random.normal(ks[3], (1, C), jnp.float32)
    # SpatialAtten conv1: 3x3, C -> CMID, no bias (HWIO).
    p["conv1_hwio"] = 0.1 * jax.random.normal(ks[4], (3, 3, C, CMID), jnp.float32)
    # BatchNorm2d(CMID) inference params, folded into scale/bias.
    gamma = 1.0 + 0.1 * jax.random.normal(ks[5], (CMID,), jnp.float32)
    beta = 0.1 * jax.random.normal(ks[6], (CMID,), jnp.float32)
    run_mean = 0.1 * jax.random.normal(ks[7], (CMID,), jnp.float32)
    run_var = 1.0 + 0.1 * jnp.abs(jax.random.normal(ks[8], (CMID,), jnp.float32))
    bn_s = gamma / jnp.sqrt(run_var + 1e-5)
    bn_t = beta - run_mean * bn_s
    p["bn_s"] = bn_s.reshape(1, CMID)
    p["bn_t"] = bn_t.reshape(1, CMID)
    # SpatialAtten conv2: 1x1, CMID -> C, no bias.
    conv2_hwio = 0.1 * jax.random.normal(ks[9], (1, 1, CMID, C), jnp.float32)
    p["conv2_hwio"] = conv2_hwio
    p["wc2"] = conv2_hwio.reshape(CMID, C)
    return p


def reference(x, p, matmul_dtype=jnp.float32):
    """Pure-JAX reference of Scale_atten_block.forward (NHWC).  matmul_dtype controls the
    convolution operand precision (bf16 matches the kernel's MXU-operand cast)."""
    avg = x.mean(axis=(1, 2))
    mx = x.max(axis=(1, 2))

    def mlp(v):
        return jnp.maximum(v @ p["w1"] + p["b1"], 0.0) @ p["w2"] + p["b2"]

    ca = jax.nn.sigmoid(mlp(avg) + mlp(mx))                     # (B, C)
    x1 = x * ca[:, None, None, :]

    dn = ("NHWC", "HWIO", "NHWC")
    y = lax.conv_general_dilated(x1.astype(matmul_dtype),
                                 p["conv1_hwio"].astype(matmul_dtype),
                                 (1, 1), "SAME", dimension_numbers=dn,
                                 preferred_element_type=jnp.float32)
    y = y * p["bn_s"][None, None] + p["bn_t"][None, None]
    y = jnp.maximum(y, 0.0)
    y = lax.conv_general_dilated(y.astype(matmul_dtype),
                                 p["conv2_hwio"].astype(matmul_dtype),
                                 (1, 1), "SAME", dimension_numbers=dn,
                                 preferred_element_type=jnp.float32)
    y = jnp.maximum(y, 0.0)
    sa = jax.nn.sigmoid(y)
    out = x1 * sa + x1
    ca_full = jnp.broadcast_to(ca[:, None, None, :], x.shape)
    return out, ca_full, sa


if __name__ == "__main__":
    B, H, W = 2, 16, 16
    gate_channels = 32
    reduction_ratio = 4
    CMID = gate_channels // reduction_ratio

    key = jax.random.PRNGKey(0)
    kx_, kp = jax.random.split(key)
    x = jax.random.normal(kx_, (B, H, W, gate_channels), jnp.float32)
    params = make_params(kp, gate_channels, CMID)
    wide = prepare_wide_params(params, B, H, W, matmul_dtype=jnp.bfloat16)

    x_out, ca_atten, sa_atten = scale_atten_block(x, wide)
    jax.block_until_ready((x_out, ca_atten, sa_atten))

    # Structure check against a reference that uses the same bf16 MXU-operand cast.
    ref_out, ref_ca, ref_sa = reference(x, params, matmul_dtype=jnp.bfloat16)
    assert jnp.allclose(ca_atten, ref_ca, atol=1e-3, rtol=1e-3)
    assert jnp.allclose(x_out, ref_out, atol=5e-3, rtol=5e-3)
    assert jnp.allclose(sa_atten, ref_sa, atol=5e-3, rtol=5e-3)

    # Sanity check against the full-f32 reference (bounds the bf16 operand error).
    f32_out, _, f32_sa = reference(x, params, matmul_dtype=jnp.float32)
    assert jnp.allclose(x_out, f32_out, atol=3e-2, rtol=3e-2)
    assert jnp.allclose(sa_atten, f32_sa, atol=3e-2, rtol=3e-2)

    print("KERNEL_OK")
</pallas_src>

<mosaic_0001>
module attributes {stable_mosaic.version = 11 : i64} {
  func.func @scale_atten_kernel(%arg0: i32, %arg1: memref<32x512xf32, #tpu.memory_space<vmem>>, %arg2: memref<33x8xf32, #tpu.memory_space<vmem>>, %arg3: memref<9x512xf32, #tpu.memory_space<vmem>>, %arg4: memref<3x512x128xbf16, #tpu.memory_space<vmem>>, %arg5: memref<2x128xf32, #tpu.memory_space<vmem>>, %arg6: memref<128x512xbf16, #tpu.memory_space<vmem>>, %arg7: memref<2x32x32xf32, #tpu.memory_space<vmem>>, %arg8: memref<32x512xf32, #tpu.memory_space<vmem>>, %arg9: memref<1x2x32xf32, #tpu.memory_space<vmem>>, %arg10: memref<32x512xf32, #tpu.memory_space<vmem>>) attributes {dimension_semantics = [#tpu.dimension_semantics<parallel>], iteration_bounds = array<i64: 1>, scalar_prefetch = 0 : i64, scratch_operands = 0 : i64, tpu.core_type = #tpu.core_type<tc>, window_params = [{transform_indices = @transform_0, window_bounds = array<i64: 32, 512>}, {pipeline_mode = #tpu.pipeline_mode<synchronous>, transform_indices = @transform_1, window_bounds = array<i64: 33, 8>}, {pipeline_mode = #tpu.pipeline_mode<synchronous>, transform_indices = @transform_2, window_bounds = array<i64: 9, 512>}, {pipeline_mode = #tpu.pipeline_mode<synchronous>, transform_indices = @transform_3, window_bounds = array<i64: 3, 512, 128>}, {pipeline_mode = #tpu.pipeline_mode<synchronous>, transform_indices = @transform_4, window_bounds = array<i64: 2, 128>}, {pipeline_mode = #tpu.pipeline_mode<synchronous>, transform_indices = @transform_5, window_bounds = array<i64: 128, 512>}, {pipeline_mode = #tpu.pipeline_mode<synchronous>, transform_indices = @transform_6, window_bounds = array<i64: 2, 32, 32>}, {transform_indices = @transform_7, window_bounds = array<i64: 32, 512>}, {transform_indices = @transform_8, window_bounds = array<i64: 1, 2, 32>}, {transform_indices = @transform_9, window_bounds = array<i64: 32, 512>}]} {
    %c0 = arith.constant 0 : index
    %c0_0 = arith.constant 0 : index
    %0 = vector.load %arg1[%c0, %c0_0] : memref<32x512xf32, #tpu.memory_space<vmem>>, vector<32x512xf32>
    %1 = vector.extract_strided_slice %0 {offsets = [0, 0], sizes = [16, 512], strides = [1, 1]} : vector<32x512xf32> to vector<16x512xf32>
    %cst = arith.constant dense<0.000000e+00> : vector<512xf32>
    %2 = vector.multi_reduction <add>, %1, %cst [0] : vector<16x512xf32> to vector<512xf32>
    %3 = vector.shape_cast %2 : vector<512xf32> to vector<1x512xf32>
    %cst_1 = arith.constant dense<0xFF800000> : vector<512xf32>
    %4 = vector.multi_reduction <maximumf>, %1, %cst_1 [0] : vector<16x512xf32> to vector<512xf32>
    %5 = vector.shape_cast %4 : vector<512xf32> to vector<1x512xf32>
    %6 = vector.extract_strided_slice %0 {offsets = [16, 0], sizes = [16, 512], strides = [1, 1]} : vector<32x512xf32> to vector<16x512xf32>
    %cst_2 = arith.constant dense<0.000000e+00> : vector<512xf32>
    %7 = vector.multi_reduction <add>, %6, %cst_2 [0] : vector<16x512xf32> to vector<512xf32>
    %8 = vector.shape_cast %7 : vector<512xf32> to vector<1x512xf32>
    %cst_3 = arith.constant dense<0xFF800000> : vector<512xf32>
    %9 = vector.multi_reduction <maximumf>, %6, %cst_3 [0] : vector<16x512xf32> to vector<512xf32>
    %10 = vector.shape_cast %9 : vector<512xf32> to vector<1x512xf32>
    %11 = tpu.concatenate %3, %8 in 0 : vector<1x512xf32>, vector<1x512xf32> -> vector<2x512xf32>
    %12 = tpu.concatenate %5, %10 in 0 : vector<1x512xf32>, vector<1x512xf32> -> vector<2x512xf32>
    %c32_i32 = arith.constant 32 : i32
    %13 = tpu.dynamic_rotate %11 by %c32_i32 dim 1 : vector<2x512xf32>, i32 -> vector<2x512xf32>
    %14 = arith.addf %11, %13 : vector<2x512xf32>
    %c32_i32_4 = arith.constant 32 : i32
    %15 = tpu.dynamic_rotate %12 by %c32_i32_4 dim 1 : vector<2x512xf32>, i32 -> vector<2x512xf32>
    %16 = arith.maximumf %12, %15 : vector<2x512xf32>
    %c64_i32 = arith.constant 64 : i32
    %17 = tpu.dynamic_rotate %14 by %c64_i32 dim 1 : vector<2x512xf32>, i32 -> vector<2x512xf32>
    %18 = arith.addf %14, %17 : vector<2x512xf32>
    %c64_i32_5 = arith.constant 64 : i32
    %19 = tpu.dynamic_rotate %16 by %c64_i32_5 dim 1 : vector<2x512xf32>, i32 -> vector<2x512xf32>
    %20 = arith.maximumf %16, %19 : vector<2x512xf32>
    %c128_i32 = arith.constant 128 : i32
    %21 = tpu.dynamic_rotate %18 by %c128_i32 dim 1 : vector<2x512xf32>, i32 -> vector<2x512xf32>
    %22 = arith.addf %18, %21 : vector<2x512xf32>
    %c128_i32_6 = arith.constant 128 : i32
    %23 = tpu.dynamic_rotate %20 by %c128_i32_6 dim 1 : vector<2x512xf32>, i32 -> vector<2x512xf32>
    %24 = arith.maximumf %20, %23 : vector<2x512xf32>
    %c256_i32 = arith.constant 256 : i32
    %25 = tpu.dynamic_rotate %22 by %c256_i32 dim 1 : vector<2x512xf32>, i32 -> vector<2x512xf32>
    %26 = arith.addf %22, %25 : vector<2x512xf32>
    %c256_i32_7 = arith.constant 256 : i32
    %27 = tpu.dynamic_rotate %24 by %c256_i32_7 dim 1 : vector<2x512xf32>, i32 -> vector<2x512xf32>
    %28 = arith.maximumf %24, %27 : vector<2x512xf32>
    %29 = vector.extract_strided_slice %26 {offsets = [0, 0], sizes = [2, 32], strides = [1, 1]} : vector<2x512xf32> to vector<2x32xf32>
    %30 = vector.extract_strided_slice %28 {offsets = [0, 0], sizes = [2, 32], strides = [1, 1]} : vector<2x512xf32> to vector<2x32xf32>
    %cst_8 = arith.constant 3.906250e-03 : f32
    %31 = vector.broadcast %cst_8 : f32 to vector<2x32xf32>
    %32 = arith.mulf %29, %31 : vector<2x32xf32>
    %c0_9 = arith.constant 0 : index
    %c0_10 = arith.constant 0 : index
    %33 = vector.load %arg2[%c0_9, %c0_10] : memref<33x8xf32, #tpu.memory_space<vmem>>, vector<32x8xf32>
    %c32 = arith.constant 32 : index
    %c0_11 = arith.constant 0 : index
    %34 = vector.load %arg2[%c32, %c0_11] : memref<33x8xf32, #tpu.memory_space<vmem>>, vector<1x8xf32>
    %c0_12 = arith.constant 0 : index
    %c0_13 = arith.constant 0 : index
    %35 = vector.load %arg3[%c0_12, %c0_13] : memref<9x512xf32, #tpu.memory_space<vmem>>, vector<8x512xf32>
    %c8 = arith.constant 8 : index
    %c0_14 = arith.constant 0 : index
    %36 = vector.load %arg3[%c8, %c0_14] : memref<9x512xf32, #tpu.memory_space<vmem>>, vector<1x512xf32>
    %37 = tpu.concatenate %32, %30 in 0 : vector<2x32xf32>, vector<2x32xf32> -> vector<4x32xf32>
    %cst_15 = arith.constant dense<0.000000e+00> : vector<4x8xf32>
    %38 = tpu.matmul %37, %33, %cst_15 {dimension_numbers = #tpu.dot_dimension_numbers<[1], [0], [0], [1], [0, 0, 1, 1], [], []>} : vector<4x32xf32>, vector<32x8xf32>, vector<4x8xf32> -> vector<4x8xf32>
    %39 = vector.broadcast %34 : vector<1x8xf32> to vector<4x8xf32>
    %40 = arith.addf %38, %39 : vector<4x8xf32>
    %cst_16 = arith.constant 0.000000e+00 : f32
    %41 = vector.broadcast %cst_16 : f32 to vector<4x8xf32>
    %42 = arith.maximumf %40, %41 : vector<4x8xf32>
    %cst_17 = arith.constant dense<0.000000e+00> : vector<4x512xf32>
    %43 = tpu.matmul %42, %35, %cst_17 {dimension_numbers = #tpu.dot_dimension_numbers<[1], [0], [0], [1], [0, 0, 1, 1], [], []>} : vector<4x8xf32>, vector<8x512xf32>, vector<4x512xf32> -> vector<4x512xf32>
    %44 = vector.broadcast %36 : vector<1x512xf32> to vector<4x512xf32>
    %45 = arith.addf %43, %44 : vector<4x512xf32>
    %46 = vector.extract_strided_slice %45 {offsets = [0, 0], sizes = [2, 512], strides = [1, 1]} : vector<4x512xf32> to vector<2x512xf32>
    %47 = vector.extract_strided_slice %45 {offsets = [2, 0], sizes = [2, 512], strides = [1, 1]} : vector<4x512xf32> to vector<2x512xf32>
    %48 = arith.addf %46, %47 : vector<2x512xf32>
    %49 = arith.negf %48 : vector<2x512xf32>
    %50 = math.exp %49 : vector<2x512xf32>
    %cst_18 = arith.constant 1.000000e+00 : f32
    %51 = vector.broadcast %cst_18 : f32 to vector<2x512xf32>
    %52 = arith.addf %51, %50 : vector<2x512xf32>
    %53 = arith.divf %51, %52 : vector<2x512xf32>
    %54 = vector.extract_strided_slice %53 {offsets = [0, 0], sizes = [2, 32], strides = [1, 1]} : vector<2x512xf32> to vector<2x32xf32>
    %c0_19 = arith.constant 0 : index
    %c0_20 = arith.constant 0 : index
    %c0_21 = arith.constant 0 : index
    %55 = vector.load %arg9[%c0_19, %c0_20, %c0_21] : memref<1x2x32xf32, #tpu.memory_space<vmem>>, vector<1x2x32xf32>
    %56 = vector.shape_cast %55 : vector<1x2x32xf32> to vector<2x32xf32>
    %57 = vector.shape_cast %54 : vector<2x32xf32> to vector<1x2x32xf32>
    tpu.vector_store %arg9[%c0_19, %c0_20, %c0_21], %57 {strides = array<i32>} : memref<1x2x32xf32, #tpu.memory_space<vmem>>, vector<1x2x32xf32>,
    %58 = vector.extract_strided_slice %0 {offsets = [0, 0], sizes = [16, 512], strides = [1, 1]} : vector<32x512xf32> to vector<16x512xf32>
    %59 = vector.extract_strided_slice %53 {offsets = [0, 0], sizes = [1, 512], strides = [1, 1]} : vector<2x512xf32> to vector<1x512xf32>
    %60 = vector.broadcast %59 : vector<1x512xf32> to vector<16x512xf32>
    %61 = arith.mulf %58, %60 : vector<16x512xf32>
    %62 = vector.extract_strided_slice %0 {offsets = [16, 0], sizes = [16, 512], strides = [1, 1]} : vector<32x512xf32> to vector<16x512xf32>
    %63 = vector.extract_strided_slice %53 {offsets = [1, 0], sizes = [1, 512], strides = [1, 1]} : vector<2x512xf32> to vector<1x512xf32>
    %64 = vector.broadcast %63 : vector<1x512xf32> to vector<16x512xf32>
    %65 = arith.mulf %62, %64 : vector<16x512xf32>
    %66 = tpu.concatenate %61, %65 in 0 : vector<16x512xf32>, vector<16x512xf32> -> vector<32x512xf32>
    %67 = arith.truncf %66 : vector<32x512xf32> to vector<32x512xbf16>
    %c0_22 = arith.constant 0 : index
    %c0_23 = arith.constant 0 : index
    %c0_24 = arith.constant 0 : index
    %68 = vector.load %arg4[%c0_22, %c0_23, %c0_24] : memref<3x512x128xbf16, #tpu.memory_space<vmem>>, vector<1x512x128xbf16>
    %69 = vector.shape_cast %68 : vector<1x512x128xbf16> to vector<512x128xbf16>
    %cst_25 = arith.constant dense<0.000000e+00> : vector<32x128xf32>
    %70 = tpu.matmul %67, %69, %cst_25 {dimension_numbers = #tpu.dot_dimension_numbers<[1], [0], [0], [1], [0, 0, 1, 1], [], []>} : vector<32x512xbf16>, vector<512x128xbf16>, vector<32x128xf32> -> vector<32x128xf32>
    %c1 = arith.constant 1 : index
    %c0_26 = arith.constant 0 : index
    %c0_27 = arith.constant 0 : index
    %71 = vector.load %arg4[%c1, %c0_26, %c0_27] : memref<3x512x128xbf16, #tpu.memory_space<vmem>>, vector<1x512x128xbf16>
    %72 = vector.shape_cast %71 : vector<1x512x128xbf16> to vector<512x128xbf16>
    %cst_28 = arith.constant dense<0.000000e+00> : vector<32x128xf32>
    %73 = tpu.matmul %67, %72, %cst_28 {dimension_numbers = #tpu.dot_dimension_numbers<[1], [0], [0], [1], [0, 0, 1, 1], [], []>} : vector<32x512xbf16>, vector<512x128xbf16>, vector<32x128xf32> -> vector<32x128xf32>
    %c2 = arith.constant 2 : index
    %c0_29 = arith.constant 0 : index
    %c0_30 = arith.constant 0 : index
    %74 = vector.load %arg4[%c2, %c0_29, %c0_30] : memref<3x512x128xbf16, #tpu.memory_space<vmem>>, vector<1x512x128xbf16>
    %75 = vector.shape_cast %74 : vector<1x512x128xbf16> to vector<512x128xbf16>
    %cst_31 = arith.constant dense<0.000000e+00> : vector<32x128xf32>
    %76 = tpu.matmul %67, %75, %cst_31 {dimension_numbers = #tpu.dot_dimension_numbers<[1], [0], [0], [1], [0, 0, 1, 1], [], []>} : vector<32x512xbf16>, vector<512x128xbf16>, vector<32x128xf32> -> vector<32x128xf32>
    %c0_32 = arith.constant 0 : index
    %c0_33 = arith.constant 0 : index
    %c0_34 = arith.constant 0 : index
    %77 = vector.load %arg7[%c0_32, %c0_33, %c0_34] : memref<2x32x32xf32, #tpu.memory_space<vmem>>, vector<1x32x32xf32>
    %78 = vector.shape_cast %77 : vector<1x32x32xf32> to vector<32x32xf32>
    %cst_35 = arith.constant dense<0.000000e+00> : vector<32x128xf32>
    %79 = tpu.matmul %78, %70, %cst_35 {dimension_numbers = #tpu.dot_dimension_numbers<[1], [0], [0], [1], [0, 0, 1, 1], [], []>} : vector<32x32xf32>, vector<32x128xf32>, vector<32x128xf32> -> vector<32x128xf32>
    %80 = arith.addf %79, %73 : vector<32x128xf32>
    %c1_36 = arith.constant 1 : index
    %c0_37 = arith.constant 0 : index
    %c0_38 = arith.constant 0 : index
    %81 = vector.load %arg7[%c1_36, %c0_37, %c0_38] : memref<2x32x32xf32, #tpu.memory_space<vmem>>, vector<1x32x32xf32>
    %82 = vector.shape_cast %81 : vector<1x32x32xf32> to vector<32x32xf32>
    %cst_39 = arith.constant dense<0.000000e+00> : vector<32x128xf32>
    %83 = tpu.matmul %82, %76, %cst_39 {dimension_numbers = #tpu.dot_dimension_numbers<[1], [0], [0], [1], [0, 0, 1, 1], [], []>} : vector<32x32xf32>, vector<32x128xf32>, vector<32x128xf32> -> vector<32x128xf32>
    %84 = arith.addf %80, %83 : vector<32x128xf32>
    %c0_40 = arith.constant 0 : index
    %c0_41 = arith.constant 0 : index
    %85 = vector.load %arg5[%c0_40, %c0_41] : memref<2x128xf32, #tpu.memory_space<vmem>>, vector<1x128xf32>
    %86 = vector.broadcast %85 : vector<1x128xf32> to vector<32x128xf32>
    %87 = arith.mulf %84, %86 : vector<32x128xf32>
    %c1_42 = arith.constant 1 : index
    %c0_43 = arith.constant 0 : index
    %88 = vector.load %arg5[%c1_42, %c0_43] : memref<2x128xf32, #tpu.memory_space<vmem>>, vector<1x128xf32>
    %89 = vector.broadcast %88 : vector<1x128xf32> to vector<32x128xf32>
    %90 = arith.addf %87, %89 : vector<32x128xf32>
    %cst_44 = arith.constant 0.000000e+00 : f32
    %91 = vector.broadcast %cst_44 : f32 to vector<32x128xf32>
    %92 = arith.maximumf %90, %91 : vector<32x128xf32>
    %93 = arith.truncf %92 : vector<32x128xf32> to vector<32x128xbf16>
    %c0_45 = arith.constant 0 : index
    %c0_46 = arith.constant 0 : index
    %94 = vector.load %arg6[%c0_45, %c0_46] : memref<128x512xbf16, #tpu.memory_space<vmem>>, vector<128x512xbf16>
    %cst_47 = arith.constant dense<0.000000e+00> : vector<32x512xf32>
    %95 = tpu.matmul %93, %94, %cst_47 {dimension_numbers = #tpu.dot_dimension_numbers<[1], [0], [0], [1], [0, 0, 1, 1], [], []>} : vector<32x128xbf16>, vector<128x512xbf16>, vector<32x512xf32> -> vector<32x512xf32>
    %cst_48 = arith.constant 0.000000e+00 : f32
    %96 = vector.broadcast %cst_48 : f32 to vector<32x512xf32>
    %97 = arith.maximumf %95, %96 : vector<32x512xf32>
    %98 = arith.negf %97 : vector<32x512xf32>
    %99 = math.exp %98 : vector<32x512xf32>
    %cst_49 = arith.constant 1.000000e+00 : f32
    %100 = vector.broadcast %cst_49 : f32 to vector<32x512xf32>
    %101 = arith.addf %100, %99 : vector<32x512xf32>
    %102 = arith.divf %100, %101 : vector<32x512xf32>
    %103 = arith.mulf %66, %102 : vector<32x512xf32>
    %104 = arith.addf %103, %66 : vector<32x512xf32>
    %c0_50 = arith.constant 0 : index
    %c0_51 = arith.constant 0 : index
    %105 = vector.load %arg8[%c0_50, %c0_51] : memref<32x512xf32, #tpu.memory_space<vmem>>, vector<32x512xf32>
    tpu.vector_store %arg8[%c0_50, %c0_51], %104 {strides = array<i32>} : memref<32x512xf32, #tpu.memory_space<vmem>>, vector<32x512xf32>,
    %c0_52 = arith.constant 0 : index
    %c0_53 = arith.constant 0 : index
    %106 = vector.load %arg10[%c0_52, %c0_53] : memref<32x512xf32, #tpu.memory_space<vmem>>, vector<32x512xf32>
    tpu.vector_store %arg10[%c0_52, %c0_53], %102 {strides = array<i32>} : memref<32x512xf32, #tpu.memory_space<vmem>>, vector<32x512xf32>,
    return
  }
  func.func @transform_0(%arg0: i32) -> (i32, i32) {
    %c0_i32 = arith.constant 0 : i32
    %c0_i32_0 = arith.constant 0 : i32
    return %arg0, %c0_i32 : i32, i32
  }
  func.func @transform_1(%arg0: i32) -> (i32, i32) {
    %c0_i32 = arith.constant 0 : i32
    %c0_i32_0 = arith.constant 0 : i32
    %c0_i32_1 = arith.constant 0 : i32
    return %c0_i32, %c0_i32_0 : i32, i32
  }
  func.func @transform_2(%arg0: i32) -> (i32, i32) {
    %c0_i32 = arith.constant 0 : i32
    %c0_i32_0 = arith.constant 0 : i32
    %c0_i32_1 = arith.constant 0 : i32
    return %c0_i32, %c0_i32_0 : i32, i32
  }
  func.func @transform_3(%arg0: i32) -> (i32, i32, i32) {
    %c0_i32 = arith.constant 0 : i32
    %c0_i32_0 = arith.constant 0 : i32
    %c0_i32_1 = arith.constant 0 : i32
    %c0_i32_2 = arith.constant 0 : i32
    return %c0_i32, %c0_i32_0, %c0_i32_1 : i32, i32, i32
  }
  func.func @transform_4(%arg0: i32) -> (i32, i32) {
    %c0_i32 = arith.constant 0 : i32
    %c0_i32_0 = arith.constant 0 : i32
    %c0_i32_1 = arith.constant 0 : i32
    return %c0_i32, %c0_i32_0 : i32, i32
  }
  func.func @transform_5(%arg0: i32) -> (i32, i32) {
    %c0_i32 = arith.constant 0 : i32
    %c0_i32_0 = arith.constant 0 : i32
    %c0_i32_1 = arith.constant 0 : i32
    return %c0_i32, %c0_i32_0 : i32, i32
  }
  func.func @transform_6(%arg0: i32) -> (i32, i32, i32) {
    %c0_i32 = arith.constant 0 : i32
    %c0_i32_0 = arith.constant 0 : i32
    %c0_i32_1 = arith.constant 0 : i32
    %c0_i32_2 = arith.constant 0 : i32
    return %c0_i32, %c0_i32_0, %c0_i32_1 : i32, i32, i32
  }
  func.func @transform_7(%arg0: i32) -> (i32, i32) {
    %c0_i32 = arith.constant 0 : i32
    %c0_i32_0 = arith.constant 0 : i32
    return %arg0, %c0_i32 : i32, i32
  }
  func.func @transform_8(%arg0: i32) -> (i32, i32, i32) {
    %c0_i32 = arith.constant 0 : i32
    %c0_i32_0 = arith.constant 0 : i32
    %c0_i32_1 = arith.constant 0 : i32
    return %arg0, %c0_i32, %c0_i32_0 : i32, i32, i32
  }
  func.func @transform_9(%arg0: i32) -> (i32, i32) {
    %c0_i32 = arith.constant 0 : i32
    %c0_i32_0 = arith.constant 0 : i32
    return %arg0, %c0_i32 : i32, i32
  }
}

</mosaic_0001>

<bundles_post_ra>
// kernel: tpu_custom_call.1
= control target key start
LH: loop header
LB: loop body
LE: loop exit
PB: predicated region body
PF: predicated region fallthrough
CT: control target
= control target key end

     0   :  { %15 = vsyncpa [#allocation3], 0  ;;  %s3706_s0 = inlined_call_operand.hbm [shape: f32[32,512], index: 0, kind: input, shape index: {}]   ;;  %s3707_s1 = inlined_call_operand.vmem [shape: f32[33,8], index: 1, kind: input, shape index: {}]   ;;  %s3708_s2 = inlined_call_operand.hbm [shape: f32[9,512], index: 2, kind: input, shape index: {}]   ;;  %s3709_s3 = inlined_call_operand.hbm [shape: bf16[3,512,128], index: 3, kind: input, shape index: {}]   ;;  %s3710_s4 = inlined_call_operand.vmem [shape: f32[2,128], index: 4, kind: input, shape index: {}]   ;;  %s3711_s5 = inlined_call_operand.hbm [shape: bf16[128,512], index: 5, kind: input, shape index: {}]   ;;  %s3712_s6 = inlined_call_operand.hbm [shape: f32[2,32,32], index: 6, kind: input, shape index: {}]   ;;  %s3713_s7 = inlined_call_operand.hbm [shape: f32[32,512], index: 7, kind: output, shape index: {0}]   ;;  %s3714_s8 = inlined_call_operand.hbm [shape: f32[1,2,32], index: 8, kind: output, shape index: {1}]   ;;  %s3715_s9 = inlined_call_operand.hbm [shape: f32[32,512], index: 9, kind: output, shape index: {2}]  }
   0x1   :  { %16 = vsyncpa [#allocation6], 0 }
   0x2   :  { %17 = vsyncpa [#allocation9], 0 }
   0x3   :  { %18 = vsyncpa [#allocation4], 0 }
   0x4   :  { %19 = vsyncpa [#allocation13], 0  ;;  %s3308_s30 = smov [#allocation5]   ;;  %s3309_s11 = smov [#allocation8]  }
   0x5   :  { %s39_s10 = sshll.u32 %s3308_s30, 4  ;;  %s65_s12 = sshll.u32 %s3309_s11, 4  ;;  %s40_s10 = int_to_ptr.vmem [resolvable:$true] %s39_s10  ;;  %s66_s12 = int_to_ptr.vmem [resolvable:$true] %s65_s12 }
   0x6   :  { %s3146_s13 = scalar_lea.vmem %s40_s10, 1024  ;;  %p3151_p1 = scmp.lt.s32.totalorder %s40_s10, %s40_s10 }
   0x7   :  { %p3147_p0 = scmp.ne.s32.totalorder %s40_s10, %s3146_s13  ;;  %p3152_p2 = scmp.lt.s32.totalorder %s3146_s13, %s3146_s13 }
   0x9   :  { %p3153_p3 = por %p3152_p2, %p3151_p1 }
   0xb   :  { %p3154_p4 = pnand %p3153_p3, %p3147_p0 }
   0xd   :  { %3157 = shalt.err (!%p3154_p4)
}
   0xe   :  { %s3310_s14 = smov 512   ;;  %s3311_s15 = smov 32  }
   0xf   :  { %45 = dma.hbm_to_vmem [thread:$0]  %s3708_s2, 1024, %s40_s10, [#allocation6], %s3310_s14, %s3310_s14, %s3311_s15  }
  0x10   :  { %s3166_s18 = scalar_lea.vmem %s66_s12, 4096  ;;  %p3171_p6 = scmp.lt.s32.totalorder %s66_s12, %s66_s12 }
  0x11   :  { %p3167_p5 = scmp.ne.s32.totalorder %s66_s12, %s3166_s18  ;;  %p3172_p7 = scmp.lt.s32.totalorder %s3166_s18, %s3166_s18 }
  0x13   :  { %p3173_p8 = por %p3172_p7, %p3171_p6 }
  0x15   :  { %p3174_p9 = pnand %p3173_p8, %p3167_p5 }
  0x17   :  { %3177 = shalt.err (!%p3174_p9)
}
  0x18   :  { %s3312_s19 = smov 256   ;;  %s3313_s20 = smov 16  }
  0x19   :  { %71 = dma.hbm_to_vmem [thread:$0]  %s3711_s5, 4096, %s66_s12, [#allocation9], %s3312_s19, %s3312_s19, %s3313_s20  }
  0x1a   :  { %s3314_s23 = smov [#allocation2]   ;;  %s3315_s25 = smov [#allocation7]  }
  0x1b   :  { %s25_s24 = sshll.u32 %s3314_s23, 4  ;;  %s51_s26 = sshll.u32 %s3315_s25, 4  ;;  %s26_s24 = int_to_ptr.vmem [resolvable:$true] %s25_s24  ;;  %s52_s26 = int_to_ptr.vmem [resolvable:$true] %s51_s26 }
  0x1c   :  { %s3186_s2 = scalar_lea.vmem %s26_s24, 2048  ;;  %p3191_p11 = scmp.lt.s32.totalorder %s26_s24, %s26_s24 }
  0x1d   :  { %p3187_p10 = scmp.ne.s32.totalorder %s26_s24, %s3186_s2  ;;  %p3192_p12 = scmp.lt.s32.totalorder %s3186_s2, %s3186_s2 }
  0x1f   :  { %p3193_p13 = por %p3192_p12, %p3191_p11 }
  0x21   :  { %p3194_p0 = pnand %p3193_p13, %p3187_p10 }
  0x23   :  { %3197 = shalt.err (!%p3194_p0)
}
  0x24   :  { %31 = dma.hbm_to_vmem [thread:$0]  %s3706_s0, 2048, %s26_s24, [#allocation3], %s3310_s14, %s3310_s14, %s3311_s15  }
  0x25   :  { %s3206_s5 = scalar_lea.vmem %s52_s26, 12288  ;;  %p3211_p2 = scmp.lt.s32.totalorder %s52_s26, %s52_s26 }
  0x26   :  { %p3207_p1 = scmp.ne.s32.totalorder %s52_s26, %s3206_s5  ;;  %p3212_p3 = scmp.lt.s32.totalorder %s3206_s5, %s3206_s5 }
  0x28   :  { %p3213_p4 = por %p3212_p3, %p3211_p2 }
  0x2a   :  { %p3214_p5 = pnand %p3213_p4, %p3207_p1 }
  0x2c   :  { %3217 = shalt.err (!%p3214_p5)
}
  0x2d   :  { %s3316_s29 = smov 64   ;;  %s3317_s30 = smov 4  }
  0x2e   :  { %57 = dma.hbm_to_vmem [thread:$0]  %s3709_s3, 12288, %s52_s26, [#allocation6], %s3316_s29, %s3316_s29, %s3317_s30  }
  0x2f   :  { %s3318_s12 = smov [#allocation10]  }
  0x30   :  { %s77_s13 = sshll.u32 %s3318_s12, 4  ;;  %s78_s13 = int_to_ptr.vmem [resolvable:$true] %s77_s13 }
  0x31   :  { %s3226_s16 = scalar_lea.vmem %s78_s13, 1024  ;;  %p3231_p7 = scmp.lt.s32.totalorder %s78_s13, %s78_s13 }
  0x32   :  { %p3227_p6 = scmp.ne.s32.totalorder %s78_s13, %s3226_s16  ;;  %p3232_p8 = scmp.lt.s32.totalorder %s3226_s16, %s3226_s16 }
  0x34   :  { %p3233_p9 = por %p3232_p8, %p3231_p7 }
  0x36   :  { %p3234_p10 = pnand %p3233_p9, %p3227_p6 }
  0x38   :  { %3237 = shalt.err (!%p3234_p10)
}
  0x39   :  { %s3319_s0 = smov 128   ;;  %s3320_s17 = smov 8  }
  0x3a   :  { %83 = dma.hbm_to_vmem [thread:$0]  %s3712_s6, 1024, %s78_s13, [#allocation9], %s3319_s0, %s3319_s0, %s3320_s17  }
  0x3b   :  { %3298 = dma.done.wait [#allocation3], 2048  }
  0x3c   :  { %3299 = vsyncadd [#allocation3], 4294965248 }
  0x3d   :  { %3300 = dma.done.wait [#allocation6], 13312  }
  0x3e   :  { %3301 = vsyncadd [#allocation6], 4294953984 }
  0x3f   :  { %3302 = dma.done.wait [#allocation9], 5120  }
  0x40   :  { %3303 = vsyncadd [#allocation9], 4294962176  ;;  %v102_v0 = vld [vmem:[#allocation2 + $0x10] sm:$0xff]  ;;  %v100_v5 = vld [vmem:[#allocation2] sm:$0xff]  ;;  %vm228_vm0 = vcmask 1040384   ;;  %vm3322_vm2 = vmmov 0  }
  0x41   :  { %v106_v1 = vld [vmem:[#allocation2 + $0x30] sm:$0xff]  ;;  %v104_v6 = vld [vmem:[#allocation2 + $0x20] sm:$0xff]  ;;  %v3402_v12 = vld [vmem:[#allocation2 + $0x18] sm:$0xff]  ;;  %vm326_vm4 = vcmask 1041408   ;;  %vm332_vm5 = vcmask 261120   ;;  %vm428_vm6 = vcmask 64512  }
  0x42   :  { %v110_v2 = vld [vmem:[#allocation2 + $0x50] sm:$0xff]  ;;  %v130_v4 = vadd.f32 %v106_v1, %v102_v0  ;;  %v3400_v7 = vmax.f32 %v102_v0, %v106_v1  ;;  %v108_v9 = vld [vmem:[#allocation2 + $0x40] sm:$0xff]  ;;  %v116_v11 = vadd.f32 %v104_v6, %v100_v5  ;;  %v3404_v13 = vmax.f32 %v100_v5, %v104_v6  ;;  %v3408_v17 = vld [vmem:[#allocation2 + $0x38] sm:$0xff] }
  0x43   :  { %v114_v3 = vld [vmem:[#allocation2 + $0x70] sm:$0xff]  ;;  %v112_v10 = vld [vmem:[#allocation2 + $0x60] sm:$0xff]  ;;  %v3410_v18 = vld [vmem:[#allocation2 + $0x58] sm:$0xff]  ;;  %v137_v24 = vadd.f32 %v3408_v17, %v3402_v12  ;;  %vm614_vm7 = vcmask 254976  }
  0x44   :  { %v186_v8 = vadd.f32 %v114_v3, %v110_v2  ;;  %v3406_v14 = vmax.f32 %v110_v2, %v114_v3  ;;  %v131_v15 = vrot.slane %v130_v4, 4  ;;  %v172_v16 = vadd.f32 %v112_v10, %v108_v9  ;;  %v3412_v19 = vld [vmem:[#allocation2 + $0x78] sm:$0xff]  ;;  %v101_v26 = vld [vmem:[#allocation2 + $0x8] sm:$0xff] }
  0x45   :  { %v3414_v20 = vmax.f32 %v108_v9, %v112_v10  ;;  %v159_v21 = vrot.slane %v3400_v7, 4  ;;  %v117_v23 = vrot.slane %v116_v11, 4  ;;  %v193_v25 = vadd.f32 %v3412_v19, %v3410_v18  ;;  %v105_v27 = vld [vmem:[#allocation2 + $0x28] sm:$0xff] }
  0x46   :  { %v187_v22 = vrot.slane %v186_v8, 4  ;;  %v109_v28 = vld [vmem:[#allocation2 + $0x48] sm:$0xff]  ;;  %v132_v29 = vadd.f32 %v131_v15, %v130_v4  ;;  %v173_v30 = vrot.slane %v172_v16, 4  ;;  %v123_v32 = vadd.f32 %v105_v27, %v101_v26 }
  0x47   :  { %v113_v31 = vld [vmem:[#allocation2 + $0x68] sm:$0xff]  ;;  %v151_v33 = vmax.f32 %v101_v26, %v105_v27  ;;  %v118_v35 = vadd.f32 %v117_v23, %v116_v11  ;;  %v138_v36 = vrot.slane %v137_v24, 4  ;;  %v194_v37 = vrot.slane %v193_v25, 4 }
  0x48   :  { %v188_v34 = vadd.f32 %v187_v22, %v186_v8  ;;  %v133_v38 = vrot.slane %v132_v29, 2  ;;  %v174_v39 = vadd.f32 %v173_v30, %v172_v16  ;;  %v124_v40 = vrot.slane %v123_v32, 4 }
  0x49   :  { %v179_v41 = vadd.f32 %v113_v31, %v109_v28  ;;  %v119_v43 = vrot.slane %v118_v35, 2  ;;  %v139_v44 = vadd.f32 %v138_v36, %v137_v24  ;;  %v195_v45 = vadd.f32 %v194_v37, %v193_v25 }
  0x4a   :  { %v189_v42 = vrot.slane %v188_v34, 2  ;;  %v134_v46 = vadd.f32 %v133_v38, %v132_v29  ;;  %v175_v47 = vrot.slane %v174_v39, 2  ;;  %v125_v48 = vadd.f32 %v124_v40, %v123_v32 }
  0x4b   :  { %v180_v49 = vrot.slane %v179_v41, 4  ;;  %v120_v51 = vadd.f32 %v119_v43, %v118_v35  ;;  %v140_v52 = vrot.slane %v139_v44, 2  ;;  %v196_v53 = vrot.slane %v195_v45, 2 }
  0x4c   :  { %v190_v50 = vadd.f32 %v189_v42, %v188_v34  ;;  %v135_v54 = vrot.slane %v134_v46, 1  ;;  %v176_v55 = vadd.f32 %v175_v47, %v174_v39  ;;  %v126_v56 = vrot.slane %v125_v48, 2 }
  0x4d   :  { %v181_v57 = vadd.f32 %v180_v49, %v179_v41  ;;  %v121_v59 = vrot.slane %v120_v51, 1  ;;  %v141_v60 = vadd.f32 %v140_v52, %v139_v44  ;;  %v197_v61 = vadd.f32 %v196_v53, %v195_v45 }
  0x4e   :  { %v191_v58 = vrot.slane %v190_v50, 1  ;;  %v136_v62 = vadd.f32 %v135_v54, %v134_v46  ;;  %v177_v63 = vrot.slane %v176_v55, 1  ;;  %v127_v0 = vadd.f32 %v126_v56, %v125_v48 }
  0x4f   :  { %v182_v1 = vrot.slane %v181_v57, 2  ;;  %v122_v3 = vadd.f32 %v121_v59, %v120_v51  ;;  %v142_v4 = vrot.slane %v141_v60, 1  ;;  %v198_v5 = vrot.slane %v197_v61, 1 }
  0x50   :  { %v192_v2 = vadd.f32 %v191_v58, %v190_v50  ;;  %v178_v6 = vadd.f32 %v177_v63, %v176_v55  ;;  %v128_v8 = vrot.slane %v127_v0, 1  ;;  %v152_v10 = vrot.slane %v151_v33, 4 }
  0x51   :  { %v183_v9 = vadd.f32 %v182_v1, %v181_v57  ;;  %v143_v15 = vadd.f32 %v142_v4, %v141_v60  ;;  %v199_v16 = vadd.f32 %v198_v5, %v197_v61  ;;  %v207_v22 = vmax.f32 %v109_v28, %v113_v31 }
  0x52   :  { %v3422_v11 = vsel %vm228_vm0, %v136_v62, %v192_v2  ;;  %v3427_v23 = vsel %vm228_vm0, %v122_v3, %v178_v6  ;;  %v129_v24 = vadd.f32 %v128_v8, %v127_v0  ;;  %v153_v26 = vmax.f32 %v151_v33, %v152_v10 }
  0x53   :  { %241 = vrot.lane.b32.xlu1 %v3422_v11, %s3311_s15  ;;  %v184_v25 = vrot.slane %v183_v9, 1  ;;  %237 = vrot.lane.b32.xlu0 %v3427_v23, %s3311_s15  ;;  %v3432_v27 = vsel %vm228_vm0, %v143_v15, %v199_v16  ;;  %v208_v29 = vrot.slane %v207_v22, 4  ;;  %v145_v30 = vrot.slane %v3404_v13, 4 }
  0x54   :  { %v201_v28 = vrot.slane %v3414_v20, 4  ;;  %v154_v32 = vrot.slane %v153_v26, 2  ;;  %v165_v34 = vmax.f32 %v3402_v12, %v3408_v17  ;;  %v221_v35 = vmax.f32 %v3410_v18, %v3412_v19 }
  0x55   :  { %v185_v31 = vadd.f32 %v184_v25, %v183_v9  ;;  %v209_v33 = vmax.f32 %v207_v22, %v208_v29  ;;  %v146_v36 = vmax.f32 %v3404_v13, %v145_v30  ;;  %v160_v38 = vmax.f32 %v3400_v7, %v159_v21 }
  0x56   :  { %v202_v37 = vmax.f32 %v3414_v20, %v201_v28  ;;  %v155_v40 = vmax.f32 %v153_v26, %v154_v32  ;;  %v166_v41 = vrot.slane %v165_v34, 4  ;;  %v222_v12 = vrot.slane %v221_v35, 4 }
  0x57   :  { %243 = vrot.lane.b32.xlu1 %v3432_v27, %s3311_s15  ;;  %v230_v39 = vsel %vm228_vm0, %v129_v24, %v185_v31  ;;  %v210_v17 = vrot.slane %v209_v33, 2  ;;  %v147_v18 = vrot.slane %v146_v36, 2  ;;  %v161_v13 = vrot.slane %v160_v38, 2 }
  0x58   :  { %239 = vrot.lane.b32.xlu0 %v230_v39, %s3311_s15  ;;  %v203_v19 = vrot.slane %v202_v37, 2  ;;  %v156_v42 = vrot.slane %v155_v40, 1  ;;  %v167_v20 = vmax.f32 %v165_v34, %v166_v41  ;;  %v223_v43 = vmax.f32 %v221_v35, %v222_v12 }
  0x59   :  { %v215_v44 = vrot.slane %v3406_v14, 4  ;;  %v211_v7 = vmax.f32 %v209_v33, %v210_v17  ;;  %v148_v21 = vmax.f32 %v146_v36, %v147_v18  ;;  %v162_v46 = vmax.f32 %v160_v38, %v161_v13  ;;  %v315_v38 = vld [vmem:[%s3707_s1 + $0x18] sm:$0xff]  ;;  %v313_v17 = vld [vmem:[%s3707_s1 + $0x8] sm:$0xff]  ;;  %v312_v18 = vld [vmem:[%s3707_s1] sm:$0xff] }
  0x5a   :  { %v204_v45 = vmax.f32 %v202_v37, %v203_v19  ;;  %v157_v47 = vmax.f32 %v155_v40, %v156_v42  ;;  %v168_v48 = vrot.slane %v167_v20, 2  ;;  %v224_v49 = vrot.slane %v223_v43, 2 }
  0x5b   :  { %v216_v50 = vmax.f32 %v3406_v14, %v215_v44  ;;  %v212_v51 = vrot.slane %v211_v7, 1  ;;  %v149_v52 = vrot.slane %v148_v21, 1  ;;  %v163_v54 = vrot.slane %v162_v46, 1 }
  0x5c   :  { %v205_v53 = vrot.slane %v204_v45, 1  ;;  %v169_v55 = vmax.f32 %v167_v20, %v168_v48  ;;  %v225_v56 = vmax.f32 %v223_v43, %v224_v49  ;;  %v245_v9 = vlaneseq }
  0x5d   :  { %v217_v57 = vrot.slane %v216_v50, 2  ;;  %v213_v58 = vmax.f32 %v211_v7, %v212_v51  ;;  %v150_v59 = vmax.f32 %v148_v21, %v149_v52  ;;  %v164_v3 = vmax.f32 %v162_v46, %v163_v54 }
  0x5e   :  { %v206_v60 = vmax.f32 %v204_v45, %v205_v53  ;;  %v170_v61 = vrot.slane %v169_v55, 1  ;;  %v226_v62 = vrot.slane %v225_v56, 1  ;;  %v3460_v10 = vand.u32 127, %v245_v9 }
  0x5f   :  { %v218_v63 = vmax.f32 %v216_v50, %v217_v57  ;;  %v234_v0 = vsel %vm228_vm0, %v157_v47, %v213_v58  ;;  %v3321_v37 = vmov 0.0  }
  0x60   :  { %v233_v1 = vsel %vm228_vm0, %v150_v59, %v206_v60  ;;  %258 = vrot.lane.b32.xlu1 %v234_v0, %s3311_s15  ;;  %v171_v14 = vmax.f32 %v169_v55, %v170_v61  ;;  %v227_v2 = vmax.f32 %v225_v56, %v226_v62  ;;  %vm247_vm1 = vcmp.lt.s32.totalorder %v3460_v10, 32  ;;  %2840 = vmatprep.subr.mxu0 %v3321_v37 }
  0x61   :  { %256 = vrot.lane.b32.xlu0 %v233_v1, %s3311_s15  ;;  %v219_v4 = vrot.slane %v218_v63, 1  ;;  %496 = vmatprep.mubr.f32.mxu1 %v3321_v37  ;;  %vm280_vm3 = vcmp.lt.s32.totalorder %v3460_v10, 64  ;;  %v320_v10 = vld [vmem:[#allocation5 + $0x18] sm:$0xff] }
  0x62   :  { %v236_v5 = vsel %vm228_vm0, %v171_v14, %v227_v2  ;;  %2841 = vmatpush3.msra.mxu0 %v315_v38  ;;  %2848 = vmatprep.mubr.msk.f32.mxu0 %vm3322_vm2, %v3321_v37  ;;  %v2906_v38 = vld [vmem:[#allocation7 + $0x28] sm:$0xff]  }
  0x63   :  { %v220_v6 = vmax.f32 %v218_v63, %v219_v4  ;;  %2842 = vmatprep.subr.mxu0 %v3321_v37 }
  0x64   :  { %262 = vrot.lane.b32.xlu1 %v236_v5, %s3311_s15 }
  0x65   :  { %v235_v8 = vsel %vm228_vm0, %v164_v3, %v220_v6 }
  0x66   :  { %260 = vrot.lane.b32.xlu0 %v235_v8, %s3311_s15 }
  0xc5   :  { %v242_v15 = vpop.permute.xlu1 %241  ;;  %v238_v16 = vpop.permute.xlu0 %237 }
  0xc9   :  { %v244_v22 = vpop.permute.xlu1 %243 }
  0xca   :  { %v251_v24 = vsel %vm247_vm1, %v244_v22, %v238_v16  ;;  %v240_v25 = vpop.permute.xlu0 %239  ;;  %v248_v31 = vsel %vm247_vm1, %v242_v15, %v244_v22  ;;  %v2489_v22 = vld [vmem:[%s3707_s1 + $0x20] ss:$0 sm:$0xff] }
  0xcb   :  { %v250_v26 = vsel %vm247_vm1, %v238_v16, %v240_v25  ;;  %v252_v29 = vadd.f32 %v251_v24, %v3427_v23  ;;  %v249_v30 = vsel %vm247_vm1, %v240_v25, %v242_v15  ;;  %v255_v34 = vadd.f32 %v248_v31, %v3432_v27  ;;  %v314_v27 = vld [vmem:[%s3707_s1 + $0x10] sm:$0xff]  ;;  %v318_v15 = vld [vmem:[#allocation5 + $0x8] sm:$0xff]  ;;  %v317_v16 = vld [vmem:[#allocation5] sm:$0xff] }
  0xcc   :  { %v253_v28 = vadd.f32 %v250_v26, %v230_v39  ;;  %v254_v32 = vadd.f32 %v249_v30, %v3422_v11  ;;  %2843 = vmatpush3.msra.mxu0 %v314_v27  ;;  %462 = vmatprep.subr.mxu1 %v318_v15  ;;  %v319_v30 = vld [vmem:[#allocation5 + $0x10] sm:$0xff]  ;;  %v2899_v31 = vld [vmem:[#allocation7 + $0x38] sm:$0xff]   ;;  %v2909_v27 = vld [vmem:[#allocation7 + $0xe8] sm:$0xff]  }
  0xcd   :  { %272 = vrot.lane.b32.xlu0 %v252_v29, %s3316_s29  ;;  %2844 = vmatprep.subr.mxu0 %v3321_v37 }
  0xce   :  { %274 = vrot.lane.b32.xlu1 %v253_v28, %s3316_s29  ;;  %2845 = vmatpush3.msra.mxu0 %v313_v17  ;;  %v2914_v17 = vld [vmem:[#allocation7 + $0x18] sm:$0xff]  }
  0xcf   :  { %2846 = vmatprep.subr.mxu0 %v3321_v37  ;;  %463 = vmatpush1.msra.mxu1 %v317_v16 }
  0xd0   :  { %2847 = vmatpush3.msra.mxu0 %v312_v18  ;;  %533 = vmatprep.subr.mxu1 %v320_v10  ;;  %v2915_v18 = vld [vmem:[#allocation7 + $0xa0] sm:$0xff]  }
  0xd1   :  { %276 = vrot.lane.b32.xlu0 %v254_v32, %s3316_s29 }
  0xd2   :  { %278 = vrot.lane.b32.xlu1 %v255_v34, %s3316_s29  ;;  %v259_v23 = vpop.permute.xlu1 %258 }
  0xd3   :  { %v257_v35 = vpop.permute.xlu0 %256 }
  0xd4   :  { %v266_v33 = vsel %vm247_vm1, %v257_v35, %v259_v23 }
  0xd5   :  { %v269_v36 = vmax.f32 %v234_v0, %v266_v33  ;;  %v2904_v33 = vld [vmem:[#allocation7 + $0x68] sm:$0xff]  }
  0xd6   :  { %v263_v11 = vpop.permute.xlu1 %262 }
  0xd7   :  { %291 = vrot.lane.b32.xlu1 %v269_v36, %s3316_s29  ;;  %v267_v39 = vsel %vm247_vm1, %v263_v11, %v257_v35  ;;  %v2903_v35 = vld [vmem:[#allocation7 + $0xb8] sm:$0xff]  }
  0xd8   :  { %v261_v40 = vpop.permute.xlu0 %260  ;;  %v268_v12 = vmax.f32 %v233_v1, %v267_v39  ;;  %v2910_v39 = vld [vmem:[#allocation7 + $0x20] sm:$0xff]  }
  0xd9   :  { %v264_v41 = vsel %vm247_vm1, %v261_v40, %v263_v11  ;;  %v265_v19 = vsel %vm247_vm1, %v259_v23, %v261_v40  ;;  %v2902_v23 = vld [vmem:[#allocation7 + $0x30] sm:$0xff]   ;;  %v2911_v40 = vld [vmem:[#allocation7 + $0xa8] sm:$0xff]  }
  0xda   :  { %v271_v13 = vmax.f32 %v236_v5, %v264_v41  ;;  %289 = vrot.lane.b32.xlu0 %v268_v12, %s3316_s29  ;;  %v270_v42 = vmax.f32 %v235_v8, %v265_v19  ;;  %v2907_v11 = vld [vmem:[#allocation7 + $0xb0] sm:$0xff]   ;;  %v2912_v41 = vld [vmem:[#allocation7 + $0x58] sm:$0xff]  }
  0xdb   :  { %v2916_v19 = vld [vmem:[#allocation7 + $0x50] sm:$0xff]  }
  0xdc   :  { %295 = vrot.lane.b32.xlu1 %v271_v13, %s3316_s29 }
  0xde   :  { %293 = vrot.lane.b32.xlu0 %v270_v42, %s3316_s29 }
 0x13f   :  { %v273_v43 = vpop.permute.xlu0 %272 }
 0x140   :  { %v275_v20 = vpop.permute.xlu1 %274 }
 0x141   :  { %v283_v48 = vsel %vm280_vm3, %v273_v43, %v275_v20 }
 0x142   :  { %v286_v54 = vadd.f32 %v283_v48, %v253_v28  ;;  %v2898_v28 = vld [vmem:[#allocation7 + $0x78] sm:$0xff]   ;;  %v2927_v48 = vld [vmem:[#allocation7 + $0x88] sm:$0xff]  }
 0x143   :  { %v277_v7 = vpop.permute.xlu0 %276 }
 0x144   :  { %v279_v44 = vpop.permute.xlu1 %278  ;;  %v282_v47 = vsel %vm280_vm3, %v275_v20, %v277_v7  ;;  %v2919_v20 = vld [vmem:[#allocation7 + $0x98] sm:$0xff]  }
 0x145   :  { %v284_v45 = vsel %vm280_vm3, %v279_v44, %v273_v43  ;;  %v281_v46 = vsel %vm280_vm3, %v277_v7, %v279_v44  ;;  %v287_v50 = vadd.f32 %v282_v47, %v254_v32  ;;  %v2900_v32 = vld [vmem:[#allocation7 + $0x70] sm:$0xff]   ;;  %v2920_v43 = vld [vmem:[#allocation7 + $0x48] sm:$0xff]   ;;  %v2926_v47 = vld [vmem:[#allocation7] sm:$0xff]  }
 0x146   :  { %v285_v49 = vadd.f32 %v284_v45, %v252_v29  ;;  %v288_v51 = vadd.f32 %v281_v46, %v255_v34  ;;  %v2901_v34 = vld [vmem:[#allocation7 + $0xf8] sm:$0xff]   ;;  %v2921_v44 = vld [vmem:[#allocation7 + $0xd0] sm:$0xff]   ;;  %v2922_v7 = vld [vmem:[#allocation7 + $0x8] sm:$0xff]  }
 0x147   :  { %v306_v58 = vadd.f32 %v287_v50, %v286_v54  ;;  %2684 = vmatprep.subr.bf16.mxu0 %v2901_v34  ;;  %v2924_v45 = vld [vmem:[#allocation7 + $0x40] sm:$0xff]   ;;  %v2925_v46 = vld [vmem:[#allocation7 + $0xc8] sm:$0xff]   ;;  %v2929_v50 = vld [vmem:[#allocation7 + $0x178] sm:$0xff]  }
 0x148   :  { %v305_v57 = vadd.f32 %v288_v51, %v285_v49  ;;  %v2928_v49 = vld [vmem:[#allocation7 + $0xc0] sm:$0xff]  }
 0x149   :  { %v292_v21 = vpop.permute.xlu1 %291  ;;  %v2930_v51 = vld [vmem:[#allocation7 + $0x80] sm:$0xff]  }
 0x14a   :  { %v309_v14 = vadd.f32 %v306_v58, %v305_v57 }
 0x14c   :  { %v290_v52 = vpop.permute.xlu0 %289  ;;  %v311_v5 = vmul.f32 0.00390625, %v309_v14 }
 0x14d   :  { %v299_v56 = vsel %vm280_vm3, %v290_v52, %v292_v21 }
 0x14e   :  { %v296_v53 = vpop.permute.xlu1 %295  ;;  %v302_v63 = vmax.f32 %v269_v36, %v299_v56  ;;  %v2905_v36 = vld [vmem:[#allocation7 + $0xf0] sm:$0xff]  }
 0x14f   :  { %v300_v55 = vsel %vm280_vm3, %v296_v53, %v290_v52  ;;  %v2933_v52 = vld [vmem:[#allocation7 + $0x1f8] sm:$0xff]  }
 0x150   :  { %v301_v59 = vmax.f32 %v268_v12, %v300_v55  ;;  %v294_v60 = vpop.permute.xlu0 %293  ;;  %v2913_v12 = vld [vmem:[#allocation7 + $0xe0] sm:$0xff]  }
 0x151   :  { %v297_v61 = vsel %vm280_vm3, %v294_v60, %v296_v53  ;;  %v298_v62 = vsel %vm280_vm3, %v292_v21, %v294_v60  ;;  %v2923_v21 = vld [vmem:[#allocation7 + $0x90] sm:$0xff]   ;;  %v409_v53 = vshrl.u32 %v245_v9, 7 }
 0x152   :  { %v303_v0 = vmax.f32 %v270_v42, %v298_v62  ;;  %v304_v1 = vmax.f32 %v271_v13, %v297_v61  ;;  %v2917_v13 = vld [vmem:[#allocation7 + $0xd8] sm:$0xff]   ;;  %v2918_v42 = vld [vmem:[#allocation7 + $0x10] sm:$0xff]  }
 0x153   :  { %v3531_v54 = vsub.s32 0, %v409_v53  ;;  %v322_v55 = vld [vmem:[#allocation5 + $0x20] ss:$8 sm:$0xf]  ;;  %v3533_v56 = vsub.s32 1, %v409_v53  ;;  %v418_v58 = vsub.s32 2, %v409_v53 }
 0x154   :  { %v307_v2 = vmax.f32 %v301_v59, %v304_v1  ;;  %v308_v3 = vmax.f32 %v303_v0, %v302_v63  ;;  %v422_v60 = vsub.s32 3, %v409_v53  ;;  %v3128_v53 = vld [vmem:[#allocation2 + $0x10] sm:$0xff] }
 0x155   :  { %v411_v57 = vrot.slane %v322_v55, %v3531_v54  ;;  %v415_v59 = vrot.slane %v322_v55, %v3533_v56  ;;  %v419_v63 = vrot.slane %v322_v55, %v418_v58 }
 0x156   :  { %v310_v4 = vmax.f32 %v307_v2, %v308_v3  ;;  %v423_v2 = vrot.slane %v322_v55, %v422_v60  ;;  %v3130_v60 = vld [vmem:[#allocation2 + $0x18] sm:$0xff] }
 0x158   :  { %v324_v6 = vrot.slane %v310_v4, 6 }
 0x15a   :  { %v327_v8 = vsel %vm326_vm4, %v311_v5, %v324_v6 }
 0x15b   :  { %2849 = vmatmul.mubr.msk.f32.vlgmr.msra.gmra.mxu0 %vm332_vm5, %v327_v8 }
 0x15c   :  { %2685 = vmatpush3.bf16.msra.mxu0 %v2903_v35 }
 0x15d   :  { %2686 = vmatprep.subr.bf16.mxu0 %v2905_v36 }
 0x160   :  { %2687 = vmatpush3.bf16.msra.mxu0 %v2907_v11 }
 0x161   :  { %2688 = vmatprep.subr.bf16.mxu0 %v2909_v27 }
 0x164   :  { %2689 = vmatpush3.bf16.msra.mxu0 %v2911_v40 }
 0x165   :  { %2690 = vmatprep.subr.bf16.mxu0 %v2913_v12 }
 0x168   :  { %2691 = vmatpush3.bf16.msra.mxu0 %v2915_v18 }
 0x169   :  { %2692 = vmatprep.subr.bf16.mxu0 %v2917_v13 }
 0x16c   :  { %2693 = vmatpush3.bf16.msra.mxu0 %v2919_v20 }
 0x16d   :  { %2694 = vmatprep.subr.bf16.mxu0 %v2921_v44 }
 0x170   :  { %2695 = vmatpush3.bf16.msra.mxu0 %v2923_v21  ;;  %v3127_v21 = vld [vmem:[#allocation2 + $0x68] sm:$0xff] }
 0x171   :  { %2696 = vmatprep.subr.bf16.mxu0 %v2925_v46 }
 0x174   :  { %2697 = vmatpush3.bf16.msra.mxu0 %v2927_v48  ;;  %v2931_v48 = vld [vmem:[#allocation7 + $0x138] sm:$0xff]  }
 0x175   :  { %2698 = vmatprep.subr.bf16.mxu0 %v2928_v49 }
 0x178   :  { %2699 = vmatpush3.bf16.msra.mxu0 %v2930_v51 }
 0x179   :  { %2740 = vmatprep.subr.bf16.mxu0 %v2933_v52  ;;  %v2932_v52 = vld [vmem:[#allocation7 + $0x170] sm:$0xff]  }
 0x21b   :  { %v402_v24 = vpop.f32.mrf.mxu0 }
 0x21c   :  { %v403_v25 = vadd.f32 %v2489_v22, %v402_v24 }
 0x21d   :  { %v2850_v26 = vpop.f32.mrf.mxu0 }
 0x21e   :  { %v406_v29 = vmax.f32 %v403_v25, 0.0 }
 0x220   :  { %2491 = vmatmul.mubr.msk.f32.vlgmr.msra.gmra.mxu1 %vm428_vm6, %v406_v29 }
 0x221   :  { %534 = vmatpush1.msra.mxu1 %v319_v30  ;;  %567 = vmatprep.mubr.f32.mxu1 %v3321_v37  ;;  %v2908_v37 = vld [vmem:[#allocation7 + $0x60] sm:$0xff]  }
 0x222   :  { %2656 = vmatprep.subr.bf16.mxu1 %v2898_v28 }
 0x224   :  { %2492 = vmatmul.mubr.msk.f32.vlgmr.msra.gmra.mxu1 %vm428_vm6, %v406_v29 }
 0x225   :  { %2657 = vmatpush3.bf16.msra.mxu1 %v2899_v31 }
 0x226   :  { %2658 = vmatprep.subr.bf16.mxu1 %v2900_v32 }
 0x229   :  { %2659 = vmatpush3.bf16.msra.mxu1 %v2902_v23 }
 0x22a   :  { %2660 = vmatprep.subr.bf16.mxu1 %v2904_v33 }
 0x22d   :  { %2661 = vmatpush3.bf16.msra.mxu1 %v2906_v38 }
 0x22e   :  { %2662 = vmatprep.subr.bf16.mxu1 %v2908_v37 }
 0x231   :  { %2663 = vmatpush3.bf16.msra.mxu1 %v2910_v39 }
 0x232   :  { %2664 = vmatprep.subr.bf16.mxu1 %v2912_v41  ;;  %v3122_v41 = vld [vmem:[#allocation2] sm:$0xff] }
 0x235   :  { %2665 = vmatpush3.bf16.msra.mxu1 %v2914_v17  ;;  %v3123_v17 = vld [vmem:[#allocation2 + $0x20] sm:$0xff] }
 0x236   :  { %2666 = vmatprep.subr.bf16.mxu1 %v2916_v19  ;;  %v3124_v19 = vld [vmem:[#allocation2 + $0x8] sm:$0xff] }
 0x239   :  { %2667 = vmatpush3.bf16.msra.mxu1 %v2918_v42  ;;  %v3125_v42 = vld [vmem:[#allocation2 + $0x28] sm:$0xff] }
 0x23a   :  { %2668 = vmatprep.subr.bf16.mxu1 %v2920_v43  ;;  %v3126_v43 = vld [vmem:[#allocation2 + $0x48] sm:$0xff] }
 0x23d   :  { %2669 = vmatpush3.bf16.msra.mxu1 %v2922_v7 }
 0x23e   :  { %2670 = vmatprep.subr.bf16.mxu1 %v2924_v45 }
 0x241   :  { %2671 = vmatpush3.bf16.msra.mxu1 %v2926_v47 }
 0x242   :  { %2712 = vmatprep.subr.bf16.mxu1 %v2929_v50 }
 0x2e0   :  { %v498_v61 = vpop.f32.mrf.mxu1 }
 0x2e1   :  { %v499_v62 = vadd.f32 %v498_v61, %v411_v57  ;;  %v3129_v57 = vld [vmem:[#allocation2 + $0x30] sm:$0xff] }
 0x2e2   :  { %v500_v0 = vpop.f32.mrf.mxu1 }
 0x2e3   :  { %v578_v1 = vrot.slane %v499_v62, 2  ;;  %v501_v14 = vadd.f32 %v500_v0, %v415_v59  ;;  %v3132_v0 = vld [vmem:[#allocation2 + $0x58] sm:$0xff] }
 0x2e4   :  { %v569_v3 = vpop.f32.mrf.mxu1 }
 0x2e5   :  { %v586_v9 = vadd.f32 %v578_v1, %v499_v62  ;;  %v579_v4 = vrot.slane %v501_v14, 2  ;;  %v570_v5 = vadd.f32 %v569_v3, %v419_v63  ;;  %v3131_v62 = vld [vmem:[#allocation2 + $0x38] sm:$0xff] }
 0x2e6   :  { %v571_v6 = vpop.f32.mrf.mxu1 }
 0x2e7   :  { %v2493_v8 = vmul.f32 -1.442695, %v586_v9  ;;  %v587_v15 = vadd.f32 %v579_v4, %v501_v14  ;;  %v580_v16 = vrot.slane %v570_v5, 2  ;;  %v572_v10 = vadd.f32 %v571_v6, %v423_v2  ;;  %v3133_v14 = vld [vmem:[#allocation2 + $0x78] sm:$0xff]  ;;  %v2934_v9 = vld [vmem:[#allocation7 + $0x130] sm:$0xff]   ;;  %v2936_v6 = vld [vmem:[#allocation7 + $0x168] sm:$0xff]  }
 0x2e8   :  { %v2935_v4 = vld [vmem:[#allocation7 + $0x1b8] sm:$0xff]  }
 0x2e9   :  { %3042 = vpow2.f32 %v2493_v8  ;;  %v2494_v22 = vmul.f32 -1.442695, %v587_v15  ;;  %v588_v24 = vadd.f32 %v580_v16, %v570_v5  ;;  %v581_v25 = vrot.slane %v572_v10, 2  ;;  %v3134_v8 = vld [vmem:[#allocation2 + $0x40] sm:$0xff] }
 0x2ea   :  { %v3135_v16 = vld [vmem:[#allocation2 + $0x60] sm:$0xff] }
 0x2eb   :  { %3044 = vpow2.f32 %v2494_v22  ;;  %v2495_v26 = vmul.f32 -1.442695, %v588_v24  ;;  %v589_v29 = vadd.f32 %v581_v25, %v572_v10  ;;  %v2937_v24 = vld [vmem:[#allocation7 + $0x1f0] sm:$0xff]  }
 0x2ed   :  { %3046 = vpow2.f32 %v2495_v26  ;;  %v2496_v30 = vmul.f32 -1.442695, %v589_v29  ;;  %v2938_v26 = vld [vmem:[#allocation7 + $0x128] sm:$0xff]   ;;  %v2939_v29 = vld [vmem:[#allocation7 + $0x1b0] sm:$0xff]  }
 0x2ef   :  { %3048 = vpow2.f32 %v2496_v30 }
 0x2f6   :  { %v3043_v28 = vpop.eup %3042 }
 0x2f7   :  { %v602_v31 = vadd.f32 1.0, %v3043_v28  ;;  %v3136_v28 = vld [vmem:[#allocation2 + $0x50] sm:$0xff] }
 0x2f8   :  { %v3045_v32 = vpop.eup %3044 }
 0x2f9   :  { %3050 = vrcp.f32 %v602_v31  ;;  %v603_v34 = vadd.f32 1.0, %v3045_v32  ;;  %v3137_v32 = vld [vmem:[#allocation2 + $0x70] sm:$0xff] }
 0x2fa   :  { %v3047_v23 = vpop.eup %3046 }
 0x2fb   :  { %3052 = vrcp.f32 %v603_v34  ;;  %v604_v35 = vadd.f32 1.0, %v3047_v23  ;;  %v2941_v23 = vld [vmem:[#allocation7 + $0x1e8] sm:$0xff]  }
 0x2fc   :  { %v3049_v33 = vpop.eup %3048 }
 0x2fd   :  { %3054 = vrcp.f32 %v604_v35  ;;  %v605_v36 = vadd.f32 1.0, %v3049_v33  ;;  %v2942_v35 = vld [vmem:[#allocation7 + $0x120] sm:$0xff]   ;;  %v2943_v33 = vld [vmem:[#allocation7 + $0x1a8] sm:$0xff]  }
 0x2ff   :  { %3056 = vrcp.f32 %v605_v36 }
 0x306   :  { %v3051_v38 = vpop.eup %3050 }
 0x307   :  { %v619_v11 = vrot.slane %v3051_v38, %v3531_v54  ;;  %615 = vst.msk [vmem:[#allocation12] sm:$0x3] %vm614_vm7, %v3051_v38  ;;  %v643_v59 = vrot.slane %v3051_v38, %v3533_v56  ;;  %v2944_v38 = vld [vmem:[#allocation7 + $0x158] sm:$0xff]  }
 0x308   :  { %v3053_v37 = vpop.eup %3052 }
 0x309   :  { %v623_v27 = vrot.slane %v3053_v37, %v3531_v54  ;;  %v647_v39 = vrot.slane %v3053_v37, %v3533_v56  ;;  %v3540_v12 = vmul.f32 %v3122_v41, %v619_v11  ;;  %v3542_v18 = vmul.f32 %v3123_v17, %v619_v11  ;;  %v2945_v11 = vld [vmem:[#allocation7 + $0x1e0] sm:$0xff]   ;;  %v2946_v37 = vld [vmem:[#allocation7 + $0x118] sm:$0xff]   ;;  %v2950_v41 = vld [vmem:[#allocation7 + $0x110] sm:$0xff]  }
 0x30a   :  { %v3055_v40 = vpop.eup %3054  ;;  %v3591_v15 = vmul.f32 %v3134_v8, %v643_v59  ;;  %v3593_v10 = vmul.f32 %v3135_v16, %v643_v59  ;;  %v2951_v17 = vld [vmem:[#allocation7 + $0x198] sm:$0xff]   ;;  %v2973_v8 = vld [vmem:[#allocation7 + $0x2e8] sm:$0xff]   ;;  %v2972_v16 = vld [vmem:[#allocation7 + $0x260] sm:$0xff]  }
 0x30b   :  { %v3544_v13 = vmul.f32 %v3124_v19, %v623_v27  ;;  %v3546_v20 = vmul.f32 %v3125_v42, %v623_v27  ;;  %v3548_v44 = vmul.f32 %v3126_v43, %v647_v39  ;;  %v3550_v45 = vmul.f32 %v3127_v21, %v647_v39  ;;  %v2947_v27 = vld [vmem:[#allocation7 + $0x1a0] sm:$0xff]   ;;  %v2948_v39 = vld [vmem:[#allocation7 + $0x150] sm:$0xff]   ;;  %v2952_v19 = vld [vmem:[#allocation7 + $0x148] sm:$0xff]  }
 0x30c   :  { %v3057_v7 = vpop.eup %3056  ;;  %v627_v46 = vrot.slane %v3055_v40, %v3531_v54  ;;  %v3561_v51 = vpack.c.bf16 %v3542_v18, %v3540_v12  ;;  %v651_v22 = vrot.slane %v3055_v40, %v3533_v56  ;;  %v3605_v30 = vpack.c.bf16 %v3593_v10, %v3591_v15  ;;  %v2949_v40 = vld [vmem:[#allocation7 + $0x1d8] sm:$0xff]   ;;  %v2953_v42 = vld [vmem:[#allocation7 + $0x1d0] sm:$0xff]   ;;  %v2954_v43 = vld [vmem:[#allocation7 + $0x108] sm:$0xff]  }
 0x30d   :  { %v3555_v47 = vpack.c.bf16 %v3546_v20, %v3544_v13  ;;  %v631_v49 = vrot.slane %v3057_v7, %v3531_v54  ;;  %v655_v50 = vrot.slane %v3057_v7, %v3533_v56  ;;  %v3571_v54 = vpack.c.bf16 %v3550_v45, %v3548_v44  ;;  %v2940_v56 = vld [vmem:[#allocation7 + $0x160] sm:$0xff]   ;;  %v2955_v7 = vld [vmem:[#allocation7 + $0x190] sm:$0xff]   ;;  %v2965_v59 = vld [vmem:[#allocation7 + $0x2f8] sm:$0xff]  }
 0x30e   :  { %v3563_v55 = vmul.f32 %v3128_v53, %v627_v46  ;;  %v3565_v58 = vmul.f32 %v3129_v57, %v627_v46  ;;  %v3607_v31 = vmul.f32 %v3136_v28, %v651_v22  ;;  %v3609_v34 = vmul.f32 %v3137_v32, %v651_v22  ;;  %v2956_v21 = vld [vmem:[#allocation7 + $0x140] sm:$0xff]   ;;  %v2957_v46 = vld [vmem:[#allocation7 + $0x1c8] sm:$0xff]   ;;  %v2963_v57 = vld [vmem:[#allocation7 + $0x238] sm:$0xff]  }
 0x30f   :  { %960 = vmatprep.mubr.bf16.mxu1 %v3555_v47  ;;  %v3573_v61 = vmul.f32 %v3130_v60, %v631_v49  ;;  %v3575_v63 = vmul.f32 %v3131_v62, %v631_v49  ;;  %v3578_v1 = vmul.f32 %v3132_v0, %v655_v50  ;;  %v3580_v2 = vmul.f32 %v3133_v14, %v655_v50  ;;  %v2959_v49 = vld [vmem:[#allocation7 + $0x188] sm:$0xff]   ;;  %v2960_v50 = vld [vmem:[#allocation7 + $0x1c0] sm:$0xff]   ;;  %v2964_v60 = vld [vmem:[#allocation7 + $0x270] sm:$0xff]  }
 0x310   :  { %961 = vmatmul.mubr.bf16.vlgmr.msra.gmra.mxu1 %v3561_v51  ;;  %v3589_v5 = vpack.c.bf16 %v3565_v58, %v3563_v55  ;;  %v3615_v36 = vpack.c.bf16 %v3609_v34, %v3607_v31  ;;  %v2962_v53 = vld [vmem:[#allocation7 + $0x180] sm:$0xff]   ;;  %v2967_v62 = vld [vmem:[#allocation7 + $0x2b8] sm:$0xff]   ;;  %v2966_v0 = vld [vmem:[#allocation7 + $0x230] sm:$0xff]  }
 0x311   :  { %2713 = vmatpush3.bf16.msra.mxu1 %v2931_v48  ;;  %968 = vmatprep.mubr.bf16.mxu1 %v3571_v54  ;;  %v3585_v3 = vpack.c.bf16 %v3575_v63, %v3573_v61  ;;  %v3600_v25 = vpack.c.bf16 %v3580_v2, %v3578_v1  ;;  %v2958_v48 = vld [vmem:[#allocation7 + $0x100] sm:$0xff]   ;;  %v2969_v14 = vld [vmem:[#allocation7 + $0x2f0] sm:$0xff]   ;;  %v2975_v22 = vld [vmem:[#allocation7 + $0x2a8] sm:$0xff]  }
 0x312   :  { %2714 = vmatprep.subr.bf16.mxu1 %v2932_v52  ;;  %v2961_v52 = vld [vmem:[#allocation7 + $0x278] sm:$0xff]  }
 0x313   :  { %1009 = vmatprep.mubr.bf16.mxu0 %v3585_v3  ;;  %v2978_v28 = vld [vmem:[#allocation7 + $0x218] sm:$0xff]  }
 0x314   :  { %1010 = vmatmul.mubr.bf16.vlgmr.msra.gmra.mxu0 %v3589_v5  ;;  %v2981_v32 = vld [vmem:[#allocation7 + $0x2d8] sm:$0xff]  }
 0x315   :  { %2715 = vmatpush3.bf16.msra.mxu1 %v2934_v9  ;;  %2741 = vmatpush3.bf16.msra.mxu0 %v2935_v4  ;;  %v2968_v9 = vld [vmem:[#allocation7 + $0x268] sm:$0xff]   ;;  %v2971_v4 = vld [vmem:[#allocation7 + $0x2b0] sm:$0xff]  }
 0x316   :  { %1017 = vmatprep.mubr.bf16.mxu0 %v3600_v25  ;;  %2716 = vmatprep.subr.bf16.mxu1 %v2936_v6  ;;  %v2970_v6 = vld [vmem:[#allocation7 + $0x228] sm:$0xff]  }
 0x317   :  { %2742 = vmatprep.subr.bf16.mxu0 %v2937_v24  ;;  %v2974_v24 = vld [vmem:[#allocation7 + $0x220] sm:$0xff]  }
 0x318   :  { %969 = vmatmul.mubr.bf16.gmra.mxu1 %v3605_v30 }
 0x319   :  { %2717 = vmatpush3.bf16.msra.mxu1 %v2938_v26  ;;  %2743 = vmatpush3.bf16.msra.mxu0 %v2939_v29  ;;  %v2977_v26 = vld [vmem:[#allocation7 + $0x2e0] sm:$0xff]   ;;  %v2976_v29 = vld [vmem:[#allocation7 + $0x258] sm:$0xff]  }
 0x31a   :  { %1315 = vmatprep.mubr.bf16.mxu1 %v3555_v47  ;;  %2718 = vmatprep.subr.bf16.mxu1 %v2940_v56  ;;  %v2979_v56 = vld [vmem:[#allocation7 + $0x2a0] sm:$0xff]  }
 0x31b   :  { %2744 = vmatprep.subr.bf16.mxu0 %v2941_v23  ;;  %v2983_v23 = vld [vmem:[#allocation7 + $0x298] sm:$0xff]  }
 0x31c   :  { %1018 = vmatmul.mubr.bf16.gmra.mxu0 %v3615_v36 }
 0x31d   :  { %2719 = vmatpush3.bf16.msra.mxu1 %v2942_v35  ;;  %2745 = vmatpush3.bf16.msra.mxu0 %v2943_v33  ;;  %v2982_v35 = vld [vmem:[#allocation7 + $0x210] sm:$0xff]  }
 0x31e   :  { %1364 = vmatprep.mubr.bf16.mxu0 %v3585_v3  ;;  %2720 = vmatprep.subr.bf16.mxu1 %v2944_v38  ;;  %v2985_v33 = vld [vmem:[#allocation7 + $0x2d0] sm:$0xff]   ;;  %v2984_v38 = vld [vmem:[#allocation7 + $0x248] sm:$0xff]  }
 0x31f   :  { %2746 = vmatprep.subr.bf16.mxu0 %v2945_v11  ;;  %v2987_v11 = vld [vmem:[#allocation7 + $0x290] sm:$0xff]  }
 0x321   :  { %2721 = vmatpush3.bf16.msra.mxu1 %v2946_v37  ;;  %2747 = vmatpush3.bf16.msra.mxu0 %v2947_v27  ;;  %v2989_v37 = vld [vmem:[#allocation7 + $0x2c8] sm:$0xff]   ;;  %v2988_v27 = vld [vmem:[#allocation7 + $0x240] sm:$0xff]  }
 0x322   :  { %2722 = vmatprep.subr.bf16.mxu1 %v2948_v39  ;;  %2748 = vmatprep.subr.bf16.mxu0 %v2949_v40  ;;  %v2991_v39 = vld [vmem:[#allocation7 + $0x288] sm:$0xff]   ;;  %v2990_v40 = vld [vmem:[#allocation7 + $0x200] sm:$0xff]  }
 0x325   :  { %2723 = vmatpush3.bf16.msra.mxu1 %v2950_v41  ;;  %2749 = vmatpush3.bf16.msra.mxu0 %v2951_v17  ;;  %v2992_v41 = vld [vmem:[#allocation7 + $0x2c0] sm:$0xff]  }
 0x326   :  { %2724 = vmatprep.subr.bf16.mxu1 %v2952_v19  ;;  %2750 = vmatprep.subr.bf16.mxu0 %v2953_v42  ;;  %v2993_v17 = vld [vmem:[#allocation7 + $0x280] sm:$0xff]  }
 0x327   :  { %v1736_v19 = vld [vmem:[#allocation10] sm:$0xff] }
 0x328   :  { %v1838_v42 = vld [vmem:[#allocation10 + $0x20] sm:$0xff] }
 0x329   :  { %2725 = vmatpush3.bf16.msra.mxu1 %v2954_v43  ;;  %2751 = vmatpush3.bf16.msra.mxu0 %v2955_v7 }
 0x32a   :  { %2726 = vmatprep.subr.bf16.mxu1 %v2956_v21  ;;  %2752 = vmatprep.subr.bf16.mxu0 %v2957_v46 }
 0x32d   :  { %2727 = vmatpush3.bf16.msra.mxu1 %v2958_v48  ;;  %2753 = vmatpush3.bf16.msra.mxu0 %v2959_v49 }
 0x32e   :  { %2754 = vmatprep.subr.bf16.mxu0 %v2960_v50  ;;  %2768 = vmatprep.subr.bf16.mxu1 %v2961_v52 }
 0x330   :  { %1316 = vmatmul.mubr.bf16.vlgmr.msra.gmra.mxu1 %v3561_v51 }
 0x331   :  { %1323 = vmatprep.mubr.bf16.mxu1 %v3571_v54  ;;  %2755 = vmatpush3.bf16.msra.mxu0 %v2962_v53 }
 0x332   :  { %2769 = vmatpush3.bf16.msra.mxu1 %v2963_v57  ;;  %2796 = vmatprep.subr.bf16.mxu0 %v2965_v59 }
 0x333   :  { %2770 = vmatprep.subr.bf16.mxu1 %v2964_v60 }
 0x334   :  { %1365 = vmatmul.mubr.bf16.vlgmr.msra.gmra.mxu0 %v3589_v5 }
 0x335   :  { %1372 = vmatprep.mubr.bf16.mxu0 %v3600_v25  ;;  %2797 = vmatpush3.bf16.msra.mxu0 %v2967_v62 }
 0x336   :  { %2771 = vmatpush3.bf16.msra.mxu1 %v2966_v0  ;;  %2798 = vmatprep.subr.bf16.mxu0 %v2969_v14 }
 0x337   :  { %2772 = vmatprep.subr.bf16.mxu1 %v2968_v9 }
 0x338   :  { %1324 = vmatmul.mubr.bf16.gmra.mxu1 %v3605_v30 }
 0x339   :  { %1670 = vmatprep.mubr.bf16.mxu1 %v3555_v47  ;;  %2799 = vmatpush3.bf16.msra.mxu0 %v2971_v4  ;;  %v2980_v47 = vld [vmem:[#allocation7 + $0x250] sm:$0xff]  }
 0x33a   :  { %2773 = vmatpush3.bf16.msra.mxu1 %v2970_v6  ;;  %2800 = vmatprep.subr.bf16.mxu0 %v2973_v8 }
 0x33b   :  { %2774 = vmatprep.subr.bf16.mxu1 %v2972_v16 }
 0x33c   :  { %1373 = vmatmul.mubr.bf16.gmra.mxu0 %v3615_v36 }
 0x33d   :  { %2801 = vmatpush3.bf16.msra.mxu0 %v2975_v22  ;;  %1719 = vmatprep.mubr.bf16.mxu0 %v3585_v3  ;;  %v2986_v3 = vld [vmem:[#allocation7 + $0x208] sm:$0xff]  }
 0x33e   :  { %2775 = vmatpush3.bf16.msra.mxu1 %v2974_v24  ;;  %2802 = vmatprep.subr.bf16.mxu0 %v2977_v26  ;;  %v1737_v26 = vld [vmem:[#allocation10 + $0x8] sm:$0xff] }
 0x33f   :  { %2776 = vmatprep.subr.bf16.mxu1 %v2976_v29  ;;  %v1738_v29 = vld [vmem:[#allocation10 + $0x10] sm:$0xff] }
 0x341   :  { %2803 = vmatpush3.bf16.msra.mxu0 %v2979_v56 }
 0x342   :  { %2777 = vmatpush3.bf16.msra.mxu1 %v2978_v28  ;;  %2804 = vmatprep.subr.bf16.mxu0 %v2981_v32  ;;  %v1739_v28 = vld [vmem:[#allocation10 + $0x18] sm:$0xff] }
 0x343   :  { %2778 = vmatprep.subr.bf16.mxu1 %v2980_v47 }
 0x345   :  { %2805 = vmatpush3.bf16.msra.mxu0 %v2983_v23 }
 0x346   :  { %2779 = vmatpush3.bf16.msra.mxu1 %v2982_v35  ;;  %2806 = vmatprep.subr.bf16.mxu0 %v2985_v33 }
 0x347   :  { %2780 = vmatprep.subr.bf16.mxu1 %v2984_v38 }
 0x349   :  { %2807 = vmatpush3.bf16.msra.mxu0 %v2987_v11 }
 0x34a   :  { %2781 = vmatpush3.bf16.msra.mxu1 %v2986_v3  ;;  %2808 = vmatprep.subr.bf16.mxu0 %v2989_v37 }
 0x34b   :  { %2782 = vmatprep.subr.bf16.mxu1 %v2988_v27 }
 0x34d   :  { %2809 = vmatpush3.bf16.msra.mxu0 %v2991_v39 }
 0x34e   :  { %2783 = vmatpush3.bf16.msra.mxu1 %v2990_v40  ;;  %2810 = vmatprep.subr.bf16.mxu0 %v2992_v41 }
 0x351   :  { %1671 = vmatmul.mubr.bf16.vlgmr.msra.gmra.mxu1 %v3561_v51  ;;  %2811 = vmatpush3.bf16.msra.mxu0 %v2993_v17 }
 0x352   :  { %1678 = vmatprep.mubr.bf16.mxu1 %v3571_v54 }
 0x354   :  { %1720 = vmatmul.mubr.bf16.vlgmr.msra.gmra.mxu0 %v3589_v5 }
 0x355   :  { %1727 = vmatprep.mubr.bf16.mxu0 %v3600_v25 }
 0x359   :  { %1679 = vmatmul.mubr.bf16.gmra.mxu1 %v3605_v30 }
 0x35a   :  { %2859 = vmatprep.mubr.msk.f32.mxu1 %vm332_vm5, %v1736_v19 }
 0x35c   :  { %1728 = vmatmul.mubr.bf16.gmra.mxu0 %v3615_v36 }
 0x35d   :  { %2873 = vmatprep.mubr.msk.f32.mxu0 %vm332_vm5, %v1838_v42 }
 0x3d0   :  { %v2672_v43 = vpop.f32.mrf.mxu1 }
 0x3d2   :  { %v2673_v7 = vpop.f32.mrf.mxu1 }
 0x3d3   :  { %v2674_v16 = vadd.f32 %v2673_v7, %v2672_v43 }
 0x3d4   :  { %v2675_v51 = vpop.f32.mrf.mxu1  ;;  %v2700_v21 = vpop.f32.mrf.mxu0 }
 0x3d6   :  { %v2676_v46 = vpop.f32.mrf.mxu1  ;;  %v2701_v54 = vpop.f32.mrf.mxu0 }
 0x3d7   :  { %v2677_v4 = vadd.f32 %v2676_v46, %v2675_v51  ;;  %v2702_v6 = vadd.f32 %v2701_v54, %v2700_v21 }
 0x3d8   :  { %v2678_v48 = vpop.f32.mrf.mxu1  ;;  %v2703_v5 = vpop.f32.mrf.mxu0 }
 0x3d9   :  { %v1012_v24 = vadd.f32 %v2702_v6, %v2674_v16 }
 0x3da   :  { %v2679_v49 = vpop.f32.mrf.mxu1  ;;  %v2704_v25 = vpop.f32.mrf.mxu0 }
 0x3db   :  { %v2680_v0 = vadd.f32 %v2679_v49, %v2678_v48  ;;  %v2705_v14 = vadd.f32 %v2704_v25, %v2703_v5 }
 0x3dc   :  { %v2681_v50 = vpop.f32.mrf.mxu1  ;;  %v2706_v30 = vpop.f32.mrf.mxu0 }
 0x3dd   :  { %v1015_v22 = vadd.f32 %v2705_v14, %v2677_v4 }
 0x3de   :  { %v2707_v52 = vpop.f32.mrf.mxu0  ;;  %v2682_v36 = vpop.f32.mrf.mxu1 }
 0x3df   :  { %v2683_v59 = vadd.f32 %v2682_v36, %v2681_v50  ;;  %v2708_v60 = vadd.f32 %v2707_v52, %v2706_v30 }
 0x3e0   :  { %v2709_v53 = vpop.f32.mrf.mxu0 }
 0x3e1   :  { %v1020_v8 = vadd.f32 %v2708_v60, %v2680_v0 }
 0x3e2   :  { %v2710_v57 = vpop.f32.mrf.mxu0 }
 0x3e3   :  { %v2711_v62 = vadd.f32 %v2710_v57, %v2709_v53 }
 0x3e5   :  { %v1023_v9 = vadd.f32 %v2711_v62, %v2683_v59 }
 0x3e7   :  { %2851 = vmatprep.subr.mxu1 %v1023_v9 }
 0x3e8   :  { %2852 = vmatpush3.msra.mxu1 %v1023_v9 }
 0x3e9   :  { %2853 = vmatprep.subr.mxu1 %v1020_v8 }
 0x3ea   :  { %2854 = vmatpush3.msra.mxu1 %v1020_v8 }
 0x3eb   :  { %2855 = vmatprep.subr.mxu1 %v1015_v22 }
 0x3ec   :  { %2856 = vmatpush3.msra.mxu1 %v1015_v22 }
 0x3ed   :  { %2857 = vmatprep.subr.mxu1 %v1012_v24 }
 0x3ee   :  { %2858 = vmatpush3.msra.mxu1 %v1012_v24 }
 0x3ef   :  { %2860 = vmatmul.mubr.msk.f32.vlgmr.msra.gmra.mxu1 %vm332_vm5, %v1737_v26 }
 0x3f0   :  { %v2728_v56 = vpop.f32.mrf.mxu1  ;;  %2862 = vmatprep.mubr.msk.f32.mxu1 %vm332_vm5, %v1738_v29 }
 0x3f2   :  { %v2729_v32 = vpop.f32.mrf.mxu1 }
 0x3f3   :  { %v2730_v47 = vadd.f32 %v2729_v32, %v2728_v56  ;;  %2863 = vmatmul.mubr.msk.f32.gmra.mxu1 %vm332_vm5, %v1739_v28 }
 0x3f4   :  { %v2731_v23 = vpop.f32.mrf.mxu1  ;;  %v2756_v35 = vpop.f32.mrf.mxu0 }
 0x3f6   :  { %v2732_v33 = vpop.f32.mrf.mxu1  ;;  %v2757_v38 = vpop.f32.mrf.mxu0 }
 0x3f7   :  { %v2733_v11 = vadd.f32 %v2732_v33, %v2731_v23  ;;  %v2758_v3 = vadd.f32 %v2757_v38, %v2756_v35 }
 0x3f8   :  { %v2734_v37 = vpop.f32.mrf.mxu1  ;;  %v2759_v27 = vpop.f32.mrf.mxu0 }
 0x3f9   :  { %v3638_v39 = vadd.f32 %v2758_v3, %v2730_v47  ;;  %v1839_v3 = vld [vmem:[#allocation10 + $0x28] sm:$0xff] }
 0x3fa   :  { %v2735_v40 = vpop.f32.mrf.mxu1  ;;  %v2760_v41 = vpop.f32.mrf.mxu0 }
 0x3fb   :  { %v2736_v17 = vadd.f32 %v2735_v40, %v2734_v37  ;;  %v2761_v19 = vadd.f32 %v2760_v41, %v2759_v27  ;;  %v1840_v37 = vld [vmem:[#allocation10 + $0x30] sm:$0xff]  ;;  %v1841_v27 = vld [vmem:[#allocation10 + $0x38] sm:$0xff] }
 0x3fc   :  { %v2737_v42 = vpop.f32.mrf.mxu1  ;;  %v2762_v43 = vpop.f32.mrf.mxu0  ;;  %v2994_v40 = vld [vmem:[#allocation8 + $0xe0] ss:$16 sps:$4 sm:$0xff]   ;;  %v2996_v41 = vld [vmem:[#allocation8 + $0xe4] ss:$16 sps:$4 sm:$0xff]  }
 0x3fd   :  { %v3640_v7 = vadd.f32 %v2761_v19, %v2733_v11  ;;  %v2999_v19 = vld [vmem:[#allocation8 + $0xec] ss:$16 sps:$4 sm:$0xff]   ;;  %2159 = vmatprep.subr.bf16.mxu1 %v2996_v41 }
 0x3fe   :  { %v2738_v51 = vpop.f32.mrf.mxu1  ;;  %v2763_v21 = vpop.f32.mrf.mxu0  ;;  %2160 = vmatpush1.bf16.msra.mxu1 %v2994_v40 }
 0x3ff   :  { %v2739_v46 = vadd.f32 %v2738_v51, %v2737_v42  ;;  %v2764_v54 = vadd.f32 %v2763_v21, %v2762_v43  ;;  %v3002_v42 = vld [vmem:[#allocation8 + $0xc4] ss:$16 sps:$4 sm:$0xff]   ;;  %v3005_v43 = vld [vmem:[#allocation8 + $0xcc] ss:$16 sps:$4 sm:$0xff]   ;;  %v3000_v51 = vld [vmem:[#allocation8 + $0xc0] ss:$16 sps:$4 sm:$0xff]  }
 0x400   :  { %v2765_v48 = vpop.f32.mrf.mxu0  ;;  %2161 = vmatprep.subr.bf16.mxu1 %v3002_v42  ;;  %v3003_v21 = vld [vmem:[#allocation8 + $0xc8] ss:$16 sps:$4 sm:$0xff]  }
 0x401   :  { %v3642_v5 = vadd.f32 %v2764_v54, %v2736_v17  ;;  %v2997_v17 = vld [vmem:[#allocation8 + $0xe8] ss:$16 sps:$4 sm:$0xff]   ;;  %v3011_v54 = vld [vmem:[#allocation8 + $0xac] ss:$16 sps:$4 sm:$0xff]  }
 0x402   :  { %v2766_v49 = vpop.f32.mrf.mxu0  ;;  %2162 = vmatpush1.bf16.msra.mxu1 %v3000_v51 }
 0x403   :  { %v2767_v25 = vadd.f32 %v2766_v49, %v2765_v48  ;;  %v3006_v48 = vld [vmem:[#allocation8 + $0xa0] ss:$16 sps:$4 sm:$0xff]   ;;  %v3009_v49 = vld [vmem:[#allocation8 + $0xa8] ss:$16 sps:$4 sm:$0xff]  }
 0x405   :  { %v3644_v50 = vadd.f32 %v2767_v25, %v2739_v46  ;;  %v3008_v46 = vld [vmem:[#allocation8 + $0xa4] ss:$16 sps:$4 sm:$0xff]  }
 0x406   :  { %2163 = vmatprep.subr.bf16.mxu1 %v3008_v46  ;;  %v3014_v25 = vld [vmem:[#allocation8 + $0x84] ss:$16 sps:$4 sm:$0xff]  }
 0x407   :  { %2164 = vmatpush1.bf16.msra.mxu1 %v3006_v48 }
 0x408   :  { %2165 = vmatprep.subr.bf16.mxu1 %v3014_v25 }
 0x411   :  { %v2784_v30 = vpop.f32.mrf.mxu1 }
 0x413   :  { %v2785_v52 = vpop.f32.mrf.mxu1 }
 0x414   :  { %v2812_v36 = vpop.f32.mrf.mxu0  ;;  %v2786_v33 = vadd.f32 %v2785_v52, %v2784_v30  ;;  %v3017_v30 = vld [vmem:[#allocation8 + $0x8c] ss:$16 sps:$4 sm:$0xff]   ;;  %v3012_v52 = vld [vmem:[#allocation8 + $0x80] ss:$16 sps:$4 sm:$0xff]  }
 0x415   :  { %v2787_v53 = vpop.f32.mrf.mxu1  ;;  %2166 = vmatpush1.bf16.msra.mxu1 %v3012_v52 }
 0x416   :  { %v2813_v57 = vpop.f32.mrf.mxu0 }
 0x417   :  { %v2788_v59 = vpop.f32.mrf.mxu1  ;;  %v2814_v23 = vadd.f32 %v2813_v57, %v2812_v36  ;;  %v3015_v36 = vld [vmem:[#allocation8 + $0x88] ss:$16 sps:$4 sm:$0xff]   ;;  %v3023_v57 = vld [vmem:[#allocation8 + $0x6c] ss:$16 sps:$4 sm:$0xff]  }
 0x418   :  { %v2815_v60 = vpop.f32.mrf.mxu0  ;;  %v2789_v47 = vadd.f32 %v2788_v59, %v2787_v53  ;;  %v3020_v53 = vld [vmem:[#allocation8 + $0x64] ss:$16 sps:$4 sm:$0xff]   ;;  %v3018_v59 = vld [vmem:[#allocation8 + $0x60] ss:$16 sps:$4 sm:$0xff]  }
 0x419   :  { %v2790_v62 = vpop.f32.mrf.mxu1  ;;  %v1722_v11 = vadd.f32 %v2814_v23, %v2786_v33  ;;  %2167 = vmatprep.subr.bf16.mxu1 %v3020_v53  ;;  %v2601_v33 = vld [vmem:[%s3710_s4] ss:$0 sm:$0xff] }
 0x41a   :  { %v2816_v0 = vpop.f32.mrf.mxu0  ;;  %2168 = vmatpush1.bf16.msra.mxu1 %v3018_v59 }
 0x41b   :  { %v2791_v14 = vpop.f32.mrf.mxu1  ;;  %v2817_v28 = vadd.f32 %v2816_v0, %v2815_v60  ;;  %v3021_v60 = vld [vmem:[#allocation8 + $0x68] ss:$16 sps:$4 sm:$0xff]   ;;  %v3029_v0 = vld [vmem:[#allocation8 + $0x4c] ss:$16 sps:$4 sm:$0xff]  }
 0x41c   :  { %v2818_v9 = vpop.f32.mrf.mxu0  ;;  %v2792_v56 = vadd.f32 %v2791_v14, %v2790_v62  ;;  %v3026_v62 = vld [vmem:[#allocation8 + $0x44] ss:$16 sps:$4 sm:$0xff]   ;;  %v3024_v14 = vld [vmem:[#allocation8 + $0x40] ss:$16 sps:$4 sm:$0xff]  }
 0x41d   :  { %v2793_v4 = vpop.f32.mrf.mxu1  ;;  %v1725_v38 = vadd.f32 %v2817_v28, %v2789_v47  ;;  %2169 = vmatprep.subr.bf16.mxu1 %v3026_v62 }
 0x41e   :  { %v2819_v6 = vpop.f32.mrf.mxu0  ;;  %2170 = vmatpush1.bf16.msra.mxu1 %v3024_v14 }
 0x41f   :  { %v2794_v8 = vpop.f32.mrf.mxu1  ;;  %v2820_v26 = vadd.f32 %v2819_v6, %v2818_v9  ;;  %v3027_v9 = vld [vmem:[#allocation8 + $0x48] ss:$16 sps:$4 sm:$0xff]   ;;  %v3035_v6 = vld [vmem:[#allocation8 + $0x2c] ss:$16 sps:$4 sm:$0xff]  }
 0x420   :  { %v2821_v16 = vpop.f32.mrf.mxu0  ;;  %v2795_v24 = vadd.f32 %v2794_v8, %v2793_v4  ;;  %v3032_v4 = vld [vmem:[#allocation8 + $0x24] ss:$16 sps:$4 sm:$0xff]   ;;  %v3030_v8 = vld [vmem:[#allocation8 + $0x20] ss:$16 sps:$4 sm:$0xff]  }
 0x421   :  { %v1730_v35 = vadd.f32 %v2820_v26, %v2792_v56  ;;  %2171 = vmatprep.subr.bf16.mxu1 %v3032_v4  ;;  %v3036_v26 = vld [vmem:[#allocation8] ss:$16 sps:$4 sm:$0xff]   ;;  %v3323_v56 = vmov 0  }
 0x422   :  { %v2822_v22 = vpop.f32.mrf.mxu0  ;;  %2172 = vmatpush1.bf16.msra.mxu1 %v3030_v8  ;;  %2191 = vmatprep.mubr.bf16.mxu1 %v3323_v56 }
 0x423   :  { %v2823_v29 = vadd.f32 %v2822_v22, %v2821_v16  ;;  %v3033_v16 = vld [vmem:[#allocation8 + $0x28] ss:$16 sps:$4 sm:$0xff]   ;;  %v3038_v22 = vld [vmem:[#allocation8 + $0x4] ss:$16 sps:$4 sm:$0xff]  }
 0x424   :  { %2173 = vmatprep.subr.bf16.mxu1 %v3038_v22 }
 0x425   :  { %v1733_v32 = vadd.f32 %v2823_v29, %v2795_v24  ;;  %v3041_v24 = vld [vmem:[#allocation8 + $0xc] ss:$16 sps:$4 sm:$0xff]   ;;  %v3039_v29 = vld [vmem:[#allocation8 + $0x8] ss:$16 sps:$4 sm:$0xff]  }
 0x426   :  { %2174 = vmatpush1.bf16.msra.mxu1 %v3036_v26 }
 0x427   :  { %2865 = vmatprep.subr.mxu0 %v1733_v32 }
 0x428   :  { %2866 = vmatpush3.msra.mxu0 %v1733_v32 }
 0x429   :  { %2867 = vmatprep.subr.mxu0 %v1730_v35 }
 0x42a   :  { %2868 = vmatpush3.msra.mxu0 %v1730_v35 }
 0x42b   :  { %2869 = vmatprep.subr.mxu0 %v1725_v38 }
 0x42c   :  { %2870 = vmatpush3.msra.mxu0 %v1725_v38 }
 0x42d   :  { %2871 = vmatprep.subr.mxu0 %v1722_v11 }
 0x42e   :  { %2872 = vmatpush3.msra.mxu0 %v1722_v11 }
 0x42f   :  { %2874 = vmatmul.mubr.msk.f32.vlgmr.msra.gmra.mxu0 %vm332_vm5, %v1839_v3  ;;  %2212 = vmatprep.subr.bf16.mxu0 %v2999_v19 }
 0x430   :  { %2876 = vmatprep.mubr.msk.f32.mxu0 %vm332_vm5, %v1840_v37  ;;  %2213 = vmatpush1.bf16.msra.mxu0 %v2997_v17  ;;  %v2602_v37 = vld [vmem:[%s3710_s4 + $0x1] ss:$0 sm:$0xff]  ;;  %s3324_s4 = smov [#allocation12]  }
 0x431   :  { %2214 = vmatprep.subr.bf16.mxu0 %v3005_v43  ;;  %s2459_s29 = sshll.u32 %s3324_s4, 4  ;;  %s2460_s29 = int_to_ptr.vmem [resolvable:$true] %s2459_s29 }
 0x432   :  { %s3238_s30 = scalar_lea.vmem %s2460_s29, 32  ;;  %p3243_p12 = scmp.lt.s32.totalorder %s2460_s29, %s2460_s29 }
 0x433   :  { %2877 = vmatmul.mubr.msk.f32.gmra.mxu0 %vm332_vm5, %v1841_v27  ;;  %p3239_p11 = scmp.ne.s32.totalorder %s2460_s29, %s3238_s30  ;;  %p3244_p13 = scmp.lt.s32.totalorder %s3238_s30, %s3238_s30 }
 0x434   :  { %2215 = vmatpush1.bf16.msra.mxu0 %v3003_v21  ;;  %2244 = vmatprep.mubr.bf16.mxu0 %v3323_v56 }
 0x435   :  { %2216 = vmatprep.subr.bf16.mxu0 %v3011_v54  ;;  %p3245_p0 = por %p3244_p13, %p3243_p12 }
 0x437   :  { %p3246_p1 = pnand %p3245_p0, %p3239_p11 }
 0x438   :  { %2217 = vmatpush1.bf16.msra.mxu0 %v3009_v49 }
 0x439   :  { %2218 = vmatprep.subr.bf16.mxu0 %v3017_v30 }
 0x43c   :  { %2219 = vmatpush1.bf16.msra.mxu0 %v3015_v36 }
 0x43d   :  { %2220 = vmatprep.subr.bf16.mxu0 %v3023_v57 }
 0x440   :  { %2221 = vmatpush1.bf16.msra.mxu0 %v3021_v60 }
 0x441   :  { %2222 = vmatprep.subr.bf16.mxu0 %v3029_v0 }
 0x444   :  { %2223 = vmatpush1.bf16.msra.mxu0 %v3027_v9 }
 0x445   :  { %2224 = vmatprep.subr.bf16.mxu0 %v3035_v6 }
 0x448   :  { %2225 = vmatpush1.bf16.msra.mxu0 %v3033_v16 }
 0x449   :  { %2226 = vmatprep.subr.bf16.mxu0 %v3041_v24 }
 0x44c   :  { %2227 = vmatpush1.bf16.msra.mxu0 %v3039_v29 }
 0x4af   :  { %v2861_v28 = vpop.f32.mrf.mxu1 }
 0x4b0   :  { %v1824_v23 = vadd.f32 %v2861_v28, %v3640_v7 }
 0x4b1   :  { %v1818_v32 = vpop.f32.mrf.mxu1 }
 0x4b2   :  { %v1819_v38 = vadd.f32 %v1818_v32, %v3638_v39 }
 0x4b3   :  { %v2864_v47 = vpop.f32.mrf.mxu1 }
 0x4b4   :  { %v1834_v40 = vadd.f32 %v2864_v47, %v3644_v50 }
 0x4b5   :  { %v1828_v3 = vpop.f32.mrf.mxu1 }
 0x4b6   :  { %v1829_v7 = vadd.f32 %v1828_v3, %v3642_v5 }
 0x4ef   :  { %v2875_v35 = vpop.f32.mrf.mxu0 }
 0x4f0   :  { %v1940_v11 = vadd.f32 %v2875_v35, %v1824_v23 }
 0x4f1   :  { %v1920_v27 = vpop.f32.mrf.mxu0 }
 0x4f2   :  { %v1949_v41 = vmul.f32 %v2601_v33, %v1940_v11  ;;  %v1939_v17 = vadd.f32 %v1920_v27, %v1819_v38 }
 0x4f3   :  { %v2878_v19 = vpop.f32.mrf.mxu0 }
 0x4f4   :  { %v1958_v42 = vadd.f32 %v2602_v37, %v1949_v41  ;;  %v1948_v43 = vmul.f32 %v2601_v33, %v1939_v17  ;;  %v1942_v51 = vadd.f32 %v2878_v19, %v1834_v40 }
 0x4f5   :  { %v1930_v21 = vpop.f32.mrf.mxu0 }
 0x4f6   :  { %v1957_v46 = vadd.f32 %v2602_v37, %v1948_v43  ;;  %v1951_v39 = vmul.f32 %v2601_v33, %v1942_v51  ;;  %v1941_v54 = vadd.f32 %v1930_v21, %v1829_v7  ;;  %v1962_v48 = vmax.f32 %v1958_v42, 0.0 }
 0x4f8   :  { %v1961_v49 = vmax.f32 %v1957_v46, 0.0  ;;  %v1960_v25 = vadd.f32 %v2602_v37, %v1951_v39  ;;  %v1950_v30 = vmul.f32 %v2601_v33, %v1941_v54 }
 0x4fa   :  { %v1965_v52 = vpack.c.bf16 %v1962_v48, %v1961_v49  ;;  %v1959_v36 = vadd.f32 %v2602_v37, %v1950_v30  ;;  %v1964_v53 = vmax.f32 %v1960_v25, 0.0 }
 0x4fc   :  { %v1963_v50 = vmax.f32 %v1959_v36, 0.0  ;;  %2192 = vmatmul.mubr.bf16.vlgmr.msra.gmra.mxu1 %v1965_v52  ;;  %2245 = vmatmul.mubr.bf16.vlgmr.msra.gmra.mxu0 %v1965_v52 }
 0x4fd   :  { %2201 = vmatprep.mubr.bf16.mxu1 %v3323_v56  ;;  %2254 = vmatprep.mubr.bf16.mxu0 %v3323_v56 }
 0x4fe   :  { %v1966_v5 = vpack.c.bf16 %v1964_v53, %v1963_v50 }
 0x504   :  { %2202 = vmatmul.mubr.bf16.gmra.mxu1 %v1966_v5  ;;  %2255 = vmatmul.mubr.bf16.gmra.mxu0 %v1966_v5 }
 0x505   :  { %3249 = shalt.err (!%p3246_p1)
}
 0x506   :  { %2462 = dma.vmem_to_hbm [thread:$0]  %s2460_s29, 32, %s3714_s8, [#allocation13]  }
 0x507   :  { %s3325_s8 = smov [#allocation14]   ;;  %s3326_s13 = smov [#allocation11]  }
 0x508   :  { %s2468_s12 = sshll.u32 %s3325_s8, 4  ;;  %s2446_s16 = sshll.u32 %s3326_s13, 4  ;;  %s2469_s12 = int_to_ptr.vmem [resolvable:$true] %s2468_s12  ;;  %s2447_s16 = int_to_ptr.vmem [resolvable:$true] %s2446_s16 }
 0x509   :  { %s3258_s0 = scalar_lea.vmem %s2469_s12, 2048  ;;  %p3263_p3 = scmp.lt.s32.totalorder %s2469_s12, %s2469_s12 }
 0x50a   :  { %p3259_p2 = scmp.ne.s32.totalorder %s2469_s12, %s3258_s0  ;;  %p3264_p4 = scmp.lt.s32.totalorder %s3258_s0, %s3258_s0 }
 0x50c   :  { %p3265_p5 = por %p3264_p4, %p3263_p3 }
 0x50e   :  { %p3266_p6 = pnand %p3265_p5, %p3259_p2 }
 0x5bc   :  { %v2193_v57 = vpop.f32.mrf.mxu1  ;;  %v2246_v59 = vpop.f32.mrf.mxu0 }
 0x5bd   :  { %v2265_v60 = vmax.f32 %v2193_v57, 0.0  ;;  %v2267_v62 = vmax.f32 %v2246_v59, 0.0 }
 0x5be   :  { %v2195_v0 = vpop.f32.mrf.mxu1  ;;  %v2248_v14 = vpop.f32.mrf.mxu0 }
 0x5bf   :  { %v2635_v9 = vmul.f32 -1.442695, %v2265_v60  ;;  %v2637_v4 = vmul.f32 -1.442695, %v2267_v62  ;;  %v2266_v6 = vmax.f32 %v2195_v0, 0.0  ;;  %v2268_v8 = vmax.f32 %v2248_v14, 0.0 }
 0x5c0   :  { %v2197_v16 = vpop.f32.mrf.mxu1  ;;  %v2250_v22 = vpop.f32.mrf.mxu0 }
 0x5c1   :  { %3058 = vpow2.f32 %v2635_v9  ;;  %v2636_v24 = vmul.f32 -1.442695, %v2266_v6  ;;  %v2638_v26 = vmul.f32 -1.442695, %v2268_v8  ;;  %v2269_v29 = vmax.f32 %v2197_v16, 0.0 }
 0x5c2   :  { %3060 = vpow2.f32 %v2637_v4  ;;  %v2271_v56 = vmax.f32 %v2250_v22, 0.0  ;;  %v2199_v28 = vpop.f32.mrf.mxu1  ;;  %v2252_v32 = vpop.f32.mrf.mxu0 }
 0x5c3   :  { %3062 = vpow2.f32 %v2636_v24  ;;  %v2639_v47 = vmul.f32 -1.442695, %v2269_v29  ;;  %v2270_v23 = vmax.f32 %v2199_v28, 0.0  ;;  %v2272_v35 = vmax.f32 %v2252_v32, 0.0 }
 0x5c4   :  { %3064 = vpow2.f32 %v2638_v26  ;;  %v2641_v33 = vmul.f32 -1.442695, %v2271_v56  ;;  %v2203_v38 = vpop.f32.mrf.mxu1  ;;  %v2256_v11 = vpop.f32.mrf.mxu0 }
 0x5c5   :  { %3066 = vpow2.f32 %v2639_v47  ;;  %v2640_v3 = vmul.f32 -1.442695, %v2270_v23  ;;  %v2642_v37 = vmul.f32 -1.442695, %v2272_v35  ;;  %v2273_v27 = vmax.f32 %v2203_v38, 0.0 }
 0x5c6   :  { %3068 = vpow2.f32 %v2641_v33  ;;  %v2275_v40 = vmax.f32 %v2256_v11, 0.0  ;;  %v2205_v41 = vpop.f32.mrf.mxu1  ;;  %v2258_v17 = vpop.f32.mrf.mxu0 }
 0x5c7   :  { %3070 = vpow2.f32 %v2640_v3  ;;  %v2643_v19 = vmul.f32 -1.442695, %v2273_v27  ;;  %v2274_v7 = vmax.f32 %v2205_v41, 0.0  ;;  %v2276_v42 = vmax.f32 %v2258_v17, 0.0 }
 0x5c8   :  { %3072 = vpow2.f32 %v2642_v37  ;;  %v2645_v43 = vmul.f32 -1.442695, %v2275_v40  ;;  %v2207_v51 = vpop.f32.mrf.mxu1  ;;  %v2260_v21 = vpop.f32.mrf.mxu0 }
 0x5c9   :  { %3074 = vpow2.f32 %v2643_v19  ;;  %v2644_v46 = vmul.f32 -1.442695, %v2274_v7  ;;  %v2646_v39 = vmul.f32 -1.442695, %v2276_v42  ;;  %v2277_v54 = vmax.f32 %v2207_v51, 0.0 }
 0x5ca   :  { %3076 = vpow2.f32 %v2645_v43  ;;  %v2279_v48 = vmax.f32 %v2260_v21, 0.0  ;;  %v2209_v49 = vpop.f32.mrf.mxu1  ;;  %v2262_v25 = vpop.f32.mrf.mxu0 }
 0x5cb   :  { %3078 = vpow2.f32 %v2644_v46  ;;  %v2647_v30 = vmul.f32 -1.442695, %v2277_v54  ;;  %v2278_v52 = vmax.f32 %v2209_v49, 0.0  ;;  %v2280_v36 = vmax.f32 %v2262_v25, 0.0 }
 0x5cc   :  { %3080 = vpow2.f32 %v2646_v39  ;;  %v2649_v53 = vmul.f32 -1.442695, %v2279_v48 }
 0x5cd   :  { %3082 = vpow2.f32 %v2647_v30  ;;  %v2648_v50 = vmul.f32 -1.442695, %v2278_v52  ;;  %v2650_v5 = vmul.f32 -1.442695, %v2280_v36 }
 0x5ce   :  { %v3059_v57 = vpop.eup %3058  ;;  %3084 = vpow2.f32 %v2649_v53 }
 0x5cf   :  { %v3061_v59 = vpop.eup %3060  ;;  %v2329_v60 = vadd.f32 1.0, %v3059_v57  ;;  %3086 = vpow2.f32 %v2648_v50 }
 0x5d0   :  { %v3063_v62 = vpop.eup %3062  ;;  %v2331_v0 = vadd.f32 1.0, %v3061_v59  ;;  %3088 = vpow2.f32 %v2650_v5 }
 0x5d1   :  { %v3065_v14 = vpop.eup %3064  ;;  %3090 = vrcp.f32 %v2329_v60  ;;  %v2330_v9 = vadd.f32 1.0, %v3063_v62 }
 0x5d2   :  { %v3067_v4 = vpop.eup %3066  ;;  %3092 = vrcp.f32 %v2331_v0  ;;  %v2332_v6 = vadd.f32 1.0, %v3065_v14 }
 0x5d3   :  { %v3069_v8 = vpop.eup %3068  ;;  %3094 = vrcp.f32 %v2330_v9  ;;  %v2333_v16 = vadd.f32 1.0, %v3067_v4 }
 0x5d4   :  { %v3071_v22 = vpop.eup %3070  ;;  %3096 = vrcp.f32 %v2332_v6  ;;  %v2335_v24 = vadd.f32 1.0, %v3069_v8 }
 0x5d5   :  { %v3073_v26 = vpop.eup %3072  ;;  %3098 = vrcp.f32 %v2333_v16  ;;  %v2334_v29 = vadd.f32 1.0, %v3071_v22 }
 0x5d6   :  { %v3075_v56 = vpop.eup %3074  ;;  %3100 = vrcp.f32 %v2335_v24  ;;  %v2336_v28 = vadd.f32 1.0, %v3073_v26 }
 0x5d7   :  { %v3077_v32 = vpop.eup %3076  ;;  %3102 = vrcp.f32 %v2334_v29  ;;  %v2337_v47 = vadd.f32 1.0, %v3075_v56 }
 0x5d8   :  { %v3079_v23 = vpop.eup %3078  ;;  %3104 = vrcp.f32 %v2336_v28  ;;  %v2339_v35 = vadd.f32 1.0, %v3077_v32 }
 0x5d9   :  { %v3081_v33 = vpop.eup %3080  ;;  %3106 = vrcp.f32 %v2337_v47  ;;  %v2338_v38 = vadd.f32 1.0, %v3079_v23 }
 0x5da   :  { %v3083_v11 = vpop.eup %3082  ;;  %3108 = vrcp.f32 %v2339_v35  ;;  %v2340_v3 = vadd.f32 1.0, %v3081_v33 }
 0x5db   :  { %v3085_v37 = vpop.eup %3084  ;;  %3110 = vrcp.f32 %v2338_v38  ;;  %v2341_v27 = vadd.f32 1.0, %v3083_v11 }
 0x5dc   :  { %v3087_v40 = vpop.eup %3086  ;;  %3112 = vrcp.f32 %v2340_v3  ;;  %v2343_v41 = vadd.f32 1.0, %v3085_v37 }
 0x5dd   :  { %v3089_v17 = vpop.eup %3088  ;;  %3114 = vrcp.f32 %v2341_v27  ;;  %v2342_v19 = vadd.f32 1.0, %v3087_v40 }
 0x5de   :  { %v3091_v7 = vpop.eup %3090  ;;  %3116 = vrcp.f32 %v2343_v41  ;;  %v2344_v42 = vadd.f32 1.0, %v3089_v17 }
 0x5df   :  { %v3093_v43 = vpop.eup %3092  ;;  %v2377_v51 = vmul.f32 %v3091_v7, %v3540_v12  ;;  %2425 = vst [vmem:[#allocation14] sm:$0xff] %v3091_v7  ;;  %3118 = vrcp.f32 %v2342_v19 }
 0x5e0   :  { %v3095_v21 = vpop.eup %3094  ;;  %v2379_v46 = vmul.f32 %v3093_v43, %v3563_v55  ;;  %2427 = vst [vmem:[#allocation14 + $0x10] sm:$0xff] %v3093_v43  ;;  %3120 = vrcp.f32 %v2344_v42 }
 0x5e1   :  { %v3097_v39 = vpop.eup %3096  ;;  %v2393_v54 = vadd.f32 %v2377_v51, %v3540_v12  ;;  %v2378_v48 = vmul.f32 %v3095_v21, %v3544_v13  ;;  %2426 = vst [vmem:[#allocation14 + $0x8] sm:$0xff] %v3095_v21 }
 0x5e2   :  { %v3099_v49 = vpop.eup %3098  ;;  %v2395_v25 = vadd.f32 %v2379_v46, %v3563_v55  ;;  %v2380_v30 = vmul.f32 %v3097_v39, %v3573_v61  ;;  %2428 = vst [vmem:[#allocation14 + $0x18] sm:$0xff] %v3097_v39 }
 0x5e3   :  { %v3101_v52 = vpop.eup %3100  ;;  %2409 = vst [vmem:[#allocation11] sm:$0xff] %v2393_v54  ;;  %v2394_v36 = vadd.f32 %v2378_v48, %v3544_v13  ;;  %v2381_v53 = vmul.f32 %v3099_v49, %v3542_v18  ;;  %2429 = vst [vmem:[#allocation14 + $0x20] sm:$0xff] %v3099_v49 }
 0x5e4   :  { %v3103_v50 = vpop.eup %3102  ;;  %2411 = vst [vmem:[#allocation11 + $0x10] sm:$0xff] %v2395_v25  ;;  %v2396_v12 = vadd.f32 %v2380_v30, %v3573_v61  ;;  %v2383_v5 = vmul.f32 %v3101_v52, %v3565_v58  ;;  %2431 = vst [vmem:[#allocation14 + $0x30] sm:$0xff] %v3101_v52 }
 0x5e5   :  { %v3105_v57 = vpop.eup %3104  ;;  %2410 = vst [vmem:[#allocation11 + $0x8] sm:$0xff] %v2394_v36  ;;  %v2397_v55 = vadd.f32 %v2381_v53, %v3542_v18  ;;  %v2382_v59 = vmul.f32 %v3103_v50, %v3546_v20  ;;  %2430 = vst [vmem:[#allocation14 + $0x28] sm:$0xff] %v3103_v50 }
 0x5e6   :  { %v3107_v60 = vpop.eup %3106  ;;  %2412 = vst [vmem:[#allocation11 + $0x18] sm:$0xff] %v2396_v12  ;;  %v2399_v13 = vadd.f32 %v2383_v5, %v3565_v58  ;;  %v2384_v62 = vmul.f32 %v3105_v57, %v3575_v63  ;;  %2432 = vst [vmem:[#allocation14 + $0x38] sm:$0xff] %v3105_v57 }
 0x5e7   :  { %v3109_v0 = vpop.eup %3108  ;;  %2413 = vst [vmem:[#allocation11 + $0x20] sm:$0xff] %v2397_v55  ;;  %v2398_v61 = vadd.f32 %v2382_v59, %v3546_v20  ;;  %v2385_v14 = vmul.f32 %v3107_v60, %v3591_v15  ;;  %2433 = vst [vmem:[#allocation14 + $0x40] sm:$0xff] %v3107_v60 }
 0x5e8   :  { %v3111_v9 = vpop.eup %3110  ;;  %2415 = vst [vmem:[#allocation11 + $0x30] sm:$0xff] %v2399_v13  ;;  %v2400_v18 = vadd.f32 %v2384_v62, %v3575_v63  ;;  %v2387_v4 = vmul.f32 %v3109_v0, %v3607_v31  ;;  %2435 = vst [vmem:[#allocation14 + $0x50] sm:$0xff] %v3109_v0 }
 0x5e9   :  { %v3113_v6 = vpop.eup %3112  ;;  %2414 = vst [vmem:[#allocation11 + $0x28] sm:$0xff] %v2398_v61  ;;  %v2401_v58 = vadd.f32 %v2385_v14, %v3591_v15  ;;  %v2386_v8 = vmul.f32 %v3111_v9, %v3548_v44  ;;  %2434 = vst [vmem:[#allocation14 + $0x48] sm:$0xff] %v3111_v9 }
 0x5ea   :  { %v3115_v20 = vpop.eup %3114  ;;  %2416 = vst [vmem:[#allocation11 + $0x38] sm:$0xff] %v2400_v18  ;;  %v2403_v16 = vadd.f32 %v2387_v4, %v3607_v31  ;;  %v2388_v22 = vmul.f32 %v3113_v6, %v3578_v1  ;;  %2436 = vst [vmem:[#allocation14 + $0x58] sm:$0xff] %v3113_v6 }
 0x5eb   :  { %v3117_v63 = vpop.eup %3116  ;;  %2417 = vst [vmem:[#allocation11 + $0x40] sm:$0xff] %v2401_v58  ;;  %v2402_v24 = vadd.f32 %v2386_v8, %v3548_v44  ;;  %v2389_v26 = vmul.f32 %v3115_v20, %v3593_v10  ;;  %2437 = vst [vmem:[#allocation14 + $0x60] sm:$0xff] %v3115_v20 }
 0x5ec   :  { %v3119_v15 = vpop.eup %3118  ;;  %2419 = vst [vmem:[#allocation11 + $0x50] sm:$0xff] %v2403_v16  ;;  %v2404_v29 = vadd.f32 %v2388_v22, %v3578_v1  ;;  %v2391_v56 = vmul.f32 %v3117_v63, %v3609_v34  ;;  %2439 = vst [vmem:[#allocation14 + $0x70] sm:$0xff] %v3117_v63 }
 0x5ed   :  { %v3121_v28 = vpop.eup %3120  ;;  %2418 = vst [vmem:[#allocation11 + $0x48] sm:$0xff] %v2402_v24  ;;  %v2405_v31 = vadd.f32 %v2389_v26, %v3593_v10  ;;  %v2390_v32 = vmul.f32 %v3119_v15, %v3550_v45  ;;  %2438 = vst [vmem:[#allocation14 + $0x68] sm:$0xff] %v3119_v15 }
 0x5ee   :  { %2420 = vst [vmem:[#allocation11 + $0x58] sm:$0xff] %v2404_v29  ;;  %v2407_v44 = vadd.f32 %v2391_v56, %v3609_v34  ;;  %v2392_v47 = vmul.f32 %v3121_v28, %v3580_v2  ;;  %2440 = vst [vmem:[#allocation14 + $0x78] sm:$0xff] %v3121_v28 }
 0x5ef   :  { %2421 = vst [vmem:[#allocation11 + $0x60] sm:$0xff] %v2405_v31  ;;  %v2406_v1 = vadd.f32 %v2390_v32, %v3550_v45 }
 0x5f0   :  { %3269 = shalt.err (!%p3266_p6)
}
 0x5f1   :  { %2474 = dma.vmem_to_hbm [thread:$0]  %s2469_s12, 2048, %s3715_s9, [#allocation13], %s3310_s14, %s3310_s14, %s3311_s15   ;;  %2423 = vst [vmem:[#allocation11 + $0x70] sm:$0xff] %v2407_v44  ;;  %v2408_v10 = vadd.f32 %v2392_v47, %v3580_v2  ;;  %2422 = vst [vmem:[#allocation11 + $0x68] sm:$0xff] %v2406_v1 }
 0x5f2   :  { %s3278_s19 = scalar_lea.vmem %s2447_s16, 2048  ;;  %p3283_p8 = scmp.lt.s32.totalorder %s2447_s16, %s2447_s16 }
 0x5f3   :  { %2424 = vst [vmem:[#allocation11 + $0x78] sm:$0xff] %v2408_v10  ;;  %p3279_p7 = scmp.ne.s32.totalorder %s2447_s16, %s3278_s19  ;;  %p3284_p9 = scmp.lt.s32.totalorder %s3278_s19, %s3278_s19 }
 0x5f5   :  { %p3285_p10 = por %p3284_p9, %p3283_p8 }
 0x5f7   :  { %p3286_p11 = pnand %p3285_p10, %p3279_p7 }
 0x5f9   :  { %3289 = shalt.err (!%p3286_p11)
}
 0x5fa   :  { %2452 = dma.vmem_to_hbm [thread:$0]  %s2447_s16, 2048, %s3713_s7, [#allocation4], %s3310_s14, %s3310_s14, %s3311_s15  }
 0x5fb   :  { %3304 = dma.done.wait [#allocation4], 2048  }
 0x5fc   :  { %3305 = vsyncadd [#allocation4], 4294965248 }
 0x5fd   :  { %3306 = dma.done.wait [#allocation13], 2080  }
 0x5fe   :  { %3307 = vsyncadd [#allocation13], 4294965216 }
 0x5ff   :  { %2484 = vsyncpa [#allocation3], 1 }
 0x600   :  { %2485 = vsyncpa [#allocation6], 1 }
 0x601   :  { %2486 = vsyncpa [#allocation9], 1 }
 0x602   :  { %2487 = vsyncpa [#allocation4], 1 }
 0x603   :  { %2488 = vsyncpa [#allocation13], 1 }

</bundles_post_ra>
